<compile_context>
chip_gen: v5e
topology: v5e:2x2
jax: 0.10.0
libtpu: 0.0.40
codegen_flags: <defaults>
</compile_context>

<pallas_src>
import functools
import math

import numpy as np

import jax
import jax.numpy as jnp
from jax import lax
from jax.experimental import pallas as pl
from jax.experimental.pallas import tpu as pltpu


# (dy-1, dx-1) offsets of the 3x3 taps, ordered (dy, dx) row-major — must match the
# (dy, dx, c) flattening of the weight matrices below.
_OFFSETS = tuple((dy - 1, dx - 1) for dy in range(3) for dx in range(3))


def _tap_masks(H, W):
    """(9, H*W) f32 0/1 masks: tap (dy, dx) is valid at flattened pixel p iff the shifted
    source pixel lies inside the image (SAME zero padding). Computed once at trace time."""
    p = np.arange(H * W)
    y, x = p // W, p % W
    rows = []
    for oy, ox in _OFFSETS:
        ok = (y + oy >= 0) & (y + oy < H) & (x + ox >= 0) & (x + ox < W)
        rows.append(ok)
    return np.stack(rows).astype(np.float32)


def convblock_kernel(W, x_ref, w1_ref, b1_ref, w2_ref, b2_ref, masks_ref, o_ref):
    """One batch element of the fused Convblock forward (NCHW-native).

    x_ref    : (Cin, H*W) f32   flattened NCHW image (free reshape in the wrapper)
    w1_ref   : (F, 9*Cin) bf16  conv1 weight, K ordered (dy, dx, cin)
    b1_ref   : (F, 1)     f32
    w2_ref   : (F, 9*F)   bf16  conv2 weight, K ordered (dy, dx, f)
    b2_ref   : (F, 1)     f32
    masks_ref: (9, H*W)   f32   0/1 SAME-padding validity mask per tap
    o_ref    : (F, H*W)   f32   NCHW-flattened output block
    """
    HW = x_ref.shape[-1]

    def im2col(src):
        # src: (C, HW) f32 -> (9*C, HW) bf16 patch matrix, K ordered (dy, dx, c).
        # Each tap is the whole image shifted by (dy-1, dx-1): a lane roll of the flattened
        # spatial axis (XLU slot) + a 0/1 mask multiply for the zero padding (VPU slot).
        # The combine is a sublane-direction concat; lanes stay dense (HW is a mult. of 128).
        pieces = []
        for k, (oy, ox) in enumerate(_OFFSETS):
            s = oy * W + ox
            shifted = src if s == 0 else pltpu.roll(src, shift=(-s) % HW, axis=1)
            valid = masks_ref[k:k + 1, :]                      # (1, HW) 0/1 f32
            pieces.append((shifted * valid).astype(jnp.bfloat16))
        return jnp.concatenate(pieces, axis=0)

    # ---- conv1 + bias + ReLU: single big-K bf16 MXU matmul, f32 accumulation ----
    patches1 = im2col(x_ref[...])                              # (9*Cin, HW) bf16
    h = jnp.dot(w1_ref[...], patches1, preferred_element_type=jnp.float32)
    h = jnp.maximum(h + b1_ref[...], 0.0)                      # (F, HW) f32

    # TODO(synk): Dropout(0.5) is identity here (eval/inference); training-mode masking with
    #             PyTorch-RNG parity is not reproduced.

    # ---- conv2 + bias + ReLU ----
    patches2 = im2col(h)                                       # (9*F, HW) bf16
    out = jnp.dot(w2_ref[...], patches2, preferred_element_type=jnp.float32)
    o_ref[...] = jnp.maximum(out + b2_ref[...], 0.0)           # lane-dense NCHW store


def convblock_forward(x_nchw, w1, b1, w2, b2):
    """x_nchw: (N, Cin, H, W) f32 -> (N, F, H, W) f32. Weights are HWIO (3, 3, in, out)."""
    N, Cin, H, W = x_nchw.shape
    F = w1.shape[-1]
    HW = H * W

    # Free reshape (contiguous trailing dims collapse): no transpose / pad / cast round trip.
    x_flat = x_nchw.reshape(N, Cin, HW)

    # HWIO -> (F, 9*C) with K ordered (dy, dx, c), matching the im2col tap/channel order.
    w1_mat = jnp.transpose(w1, (3, 0, 1, 2)).reshape(F, 9 * Cin).astype(jnp.bfloat16)
    w2_mat = jnp.transpose(w2, (3, 0, 1, 2)).reshape(F, 9 * F).astype(jnp.bfloat16)
    b1_col = b1.reshape(F, 1).astype(jnp.float32)
    b2_col = b2.reshape(F, 1).astype(jnp.float32)
    masks = jnp.asarray(_tap_masks(H, W))                      # (9, HW) f32, 0/1

    # TODO(synk): for large images the whole (Cin, H*W) / (F, H*W) working set should be
    #             re-tiled over H (halo'd row blocks) to respect v7x's 64 MiB VMEM.
    kernel = functools.partial(convblock_kernel, W)

    out_flat = pl.pallas_call(
        kernel,
        out_shape=jax.ShapeDtypeStruct((N, F, HW), jnp.float32),
        grid=(N,),
        in_specs=[
            # Per-batch-element image block; weights/biases/masks have constant block
            # indices so they stay resident across grid steps.
            pl.BlockSpec((None, Cin, HW), lambda n: (n, 0, 0)),
            pl.BlockSpec((F, 9 * Cin), lambda n: (0, 0)),
            pl.BlockSpec((F, 1), lambda n: (0, 0)),
            pl.BlockSpec((F, 9 * F), lambda n: (0, 0)),
            pl.BlockSpec((F, 1), lambda n: (0, 0)),
            pl.BlockSpec((9, HW), lambda n: (0, 0)),
        ],
        out_specs=pl.BlockSpec((None, F, HW), lambda n: (n, 0, 0)),
        compiler_params=pltpu.CompilerParams(
            # N parallel steps: >=2 keeps both v7x TensorCores busy; on v5e/v6e each step
            # is one fat, fully pipelined image.
            dimension_semantics=("parallel",),
            # Real per-step working set (double-buffered blocks + in-kernel values) is
            # well under 1 MiB at these shapes; 8 MiB leaves headroom and sits comfortably
            # below every generation's scoped-VMEM ceiling (incl. v7x's 64 MiB physical).
            vmem_limit_bytes=8 * 1024 * 1024,
        ),
    )(x_flat, w1_mat, b1_col, w2_mat, b2_col, masks)

    # Output is already NCHW-ordered: this reshape is free.
    return out_flat.reshape(N, F, H, W)


def reference_forward(x_nchw, w1, b1, w2, b2):
    """Pure-JAX f32 reference (module semantics) for a loose sanity check."""
    x = jnp.transpose(x_nchw, (0, 2, 3, 1))
    dn = ("NHWC", "HWIO", "NHWC")
    h = lax.conv_general_dilated(x, w1, (1, 1), "SAME", dimension_numbers=dn)
    h = jnp.maximum(h + b1, 0.0)
    o = lax.conv_general_dilated(h, w2, (1, 1), "SAME", dimension_numbers=dn)
    o = jnp.maximum(o + b2, 0.0)
    return jnp.transpose(o, (0, 3, 1, 2))


def reference_forward_bf16(x_nchw, w1, b1, w2, b2):
    """Reference modelling the kernel's bf16 MXU operands with f32 accumulation."""
    x = jnp.transpose(x_nchw, (0, 2, 3, 1)).astype(jnp.bfloat16)
    dn = ("NHWC", "HWIO", "NHWC")
    h = lax.conv_general_dilated(x, w1.astype(jnp.bfloat16), (1, 1), "SAME",
                                 dimension_numbers=dn,
                                 preferred_element_type=jnp.float32)
    h = jnp.maximum(h + b1, 0.0).astype(jnp.bfloat16)
    o = lax.conv_general_dilated(h, w2.astype(jnp.bfloat16), (1, 1), "SAME",
                                 dimension_numbers=dn,
                                 preferred_element_type=jnp.float32)
    o = jnp.maximum(o + b2, 0.0)
    return jnp.transpose(o, (0, 3, 1, 2))


def init_params(key, input_channel, feature_dim):
    """Kaiming-normal (fan_in, gain=sqrt(2)) weights, zero biases — same distribution as the
    module's _init_weights (values are synthetic). Weights returned in HWIO layout."""
    k1, k2 = jax.random.split(key)
    fan_in1 = input_channel * 3 * 3
    fan_in2 = feature_dim * 3 * 3
    w1 = jax.random.normal(k1, (3, 3, input_channel, feature_dim), jnp.float32) * math.sqrt(2.0 / fan_in1)
    w2 = jax.random.normal(k2, (3, 3, feature_dim, feature_dim), jnp.float32) * math.sqrt(2.0 / fan_in2)
    b1 = jnp.zeros((feature_dim,), jnp.float32)
    b2 = jnp.zeros((feature_dim,), jnp.float32)
    return w1, b1, w2, b2


if __name__ == "__main__":
    N, Cin, H, W = 2, 4, 16, 16
    feature_dim = 32

    key = jax.random.PRNGKey(0)
    kx, kp = jax.random.split(key)
    x = jax.random.normal(kx, (N, Cin, H, W), jnp.float32)   # PyTorch NCHW input
    w1, b1, w2, b2 = init_params(kp, Cin, feature_dim)

    fwd = jax.jit(convblock_forward)
    out = jax.block_until_ready(fwd(x, w1, b1, w2, b2))
    assert out.shape == (N, feature_dim, H, W), out.shape

    # Tight check vs. a reference that models the bf16 MXU operands exactly.
    ref_bf16 = reference_forward_bf16(x, w1, b1, w2, b2)
    err_t = float(jnp.max(jnp.abs(out - ref_bf16)))
    assert jnp.allclose(out, ref_bf16, atol=5e-3, rtol=5e-3), err_t

    # Loose sanity check vs. full-f32 module semantics (bf16 operand rounding only).
    ref_f32 = reference_forward(x, w1, b1, w2, b2)
    err_l = float(jnp.max(jnp.abs(out - ref_f32)))
    assert jnp.allclose(out, ref_f32, atol=1e-1, rtol=1e-1), err_l

    print("KERNEL_OK")
</pallas_src>

<mosaic_0001>
module attributes {stable_mosaic.version = 11 : i64} {
  func.func @convblock_kernel(%arg0: i32, %arg1: memref<1x4x256xf32, #tpu.memory_space<vmem>>, %arg2: memref<32x36xbf16, #tpu.memory_space<vmem>>, %arg3: memref<32x1xf32, #tpu.memory_space<vmem>>, %arg4: memref<32x288xbf16, #tpu.memory_space<vmem>>, %arg5: memref<32x1xf32, #tpu.memory_space<vmem>>, %arg6: memref<9x256xf32, #tpu.memory_space<vmem>>, %arg7: memref<1x32x256xf32, #tpu.memory_space<vmem>>) attributes {dimension_semantics = [#tpu.dimension_semantics<parallel>], iteration_bounds = array<i64: 2>, scalar_prefetch = 0 : i64, scratch_operands = 0 : i64, tpu.core_type = #tpu.core_type<tc>, window_params = [{transform_indices = @transform_0, window_bounds = array<i64: 1, 4, 256>}, {pipeline_mode = #tpu.pipeline_mode<synchronous>, transform_indices = @transform_1, window_bounds = array<i64: 32, 36>}, {pipeline_mode = #tpu.pipeline_mode<synchronous>, transform_indices = @transform_2, window_bounds = array<i64: 32, 1>}, {pipeline_mode = #tpu.pipeline_mode<synchronous>, transform_indices = @transform_3, window_bounds = array<i64: 32, 288>}, {pipeline_mode = #tpu.pipeline_mode<synchronous>, transform_indices = @transform_4, window_bounds = array<i64: 32, 1>}, {pipeline_mode = #tpu.pipeline_mode<synchronous>, transform_indices = @transform_5, window_bounds = array<i64: 9, 256>}, {transform_indices = @transform_6, window_bounds = array<i64: 1, 32, 256>}]} {
    %c0 = arith.constant 0 : index
    %c0_0 = arith.constant 0 : index
    %c0_1 = arith.constant 0 : index
    %0 = vector.load %arg1[%c0, %c0_0, %c0_1] : memref<1x4x256xf32, #tpu.memory_space<vmem>>, vector<1x4x256xf32>
    %1 = vector.shape_cast %0 : vector<1x4x256xf32> to vector<4x256xf32>
    %c17_i32 = arith.constant 17 : i32
    %2 = tpu.dynamic_rotate %1 by %c17_i32 dim 1 : vector<4x256xf32>, i32 -> vector<4x256xf32>
    %c0_2 = arith.constant 0 : index
    %c0_3 = arith.constant 0 : index
    %3 = vector.load %arg6[%c0_2, %c0_3] : memref<9x256xf32, #tpu.memory_space<vmem>>, vector<1x256xf32>
    %4 = vector.broadcast %3 : vector<1x256xf32> to vector<4x256xf32>
    %5 = arith.mulf %2, %4 : vector<4x256xf32>
    %6 = arith.truncf %5 : vector<4x256xf32> to vector<4x256xbf16>
    %c16_i32 = arith.constant 16 : i32
    %7 = tpu.dynamic_rotate %1 by %c16_i32 dim 1 : vector<4x256xf32>, i32 -> vector<4x256xf32>
    %c1 = arith.constant 1 : index
    %c0_4 = arith.constant 0 : index
    %8 = vector.load %arg6[%c1, %c0_4] : memref<9x256xf32, #tpu.memory_space<vmem>>, vector<1x256xf32>
    %9 = vector.broadcast %8 : vector<1x256xf32> to vector<4x256xf32>
    %10 = arith.mulf %7, %9 : vector<4x256xf32>
    %11 = arith.truncf %10 : vector<4x256xf32> to vector<4x256xbf16>
    %c15_i32 = arith.constant 15 : i32
    %12 = tpu.dynamic_rotate %1 by %c15_i32 dim 1 : vector<4x256xf32>, i32 -> vector<4x256xf32>
    %c2 = arith.constant 2 : index
    %c0_5 = arith.constant 0 : index
    %13 = vector.load %arg6[%c2, %c0_5] : memref<9x256xf32, #tpu.memory_space<vmem>>, vector<1x256xf32>
    %14 = vector.broadcast %13 : vector<1x256xf32> to vector<4x256xf32>
    %15 = arith.mulf %12, %14 : vector<4x256xf32>
    %16 = arith.truncf %15 : vector<4x256xf32> to vector<4x256xbf16>
    %c1_i32 = arith.constant 1 : i32
    %17 = tpu.dynamic_rotate %1 by %c1_i32 dim 1 : vector<4x256xf32>, i32 -> vector<4x256xf32>
    %c3 = arith.constant 3 : index
    %c0_6 = arith.constant 0 : index
    %18 = vector.load %arg6[%c3, %c0_6] : memref<9x256xf32, #tpu.memory_space<vmem>>, vector<1x256xf32>
    %19 = vector.broadcast %18 : vector<1x256xf32> to vector<4x256xf32>
    %20 = arith.mulf %17, %19 : vector<4x256xf32>
    %21 = arith.truncf %20 : vector<4x256xf32> to vector<4x256xbf16>
    %c4 = arith.constant 4 : index
    %c0_7 = arith.constant 0 : index
    %22 = vector.load %arg6[%c4, %c0_7] : memref<9x256xf32, #tpu.memory_space<vmem>>, vector<1x256xf32>
    %23 = vector.broadcast %22 : vector<1x256xf32> to vector<4x256xf32>
    %24 = arith.mulf %1, %23 : vector<4x256xf32>
    %25 = arith.truncf %24 : vector<4x256xf32> to vector<4x256xbf16>
    %c255_i32 = arith.constant 255 : i32
    %26 = tpu.dynamic_rotate %1 by %c255_i32 dim 1 : vector<4x256xf32>, i32 -> vector<4x256xf32>
    %c5 = arith.constant 5 : index
    %c0_8 = arith.constant 0 : index
    %27 = vector.load %arg6[%c5, %c0_8] : memref<9x256xf32, #tpu.memory_space<vmem>>, vector<1x256xf32>
    %28 = vector.broadcast %27 : vector<1x256xf32> to vector<4x256xf32>
    %29 = arith.mulf %26, %28 : vector<4x256xf32>
    %30 = arith.truncf %29 : vector<4x256xf32> to vector<4x256xbf16>
    %c241_i32 = arith.constant 241 : i32
    %31 = tpu.dynamic_rotate %1 by %c241_i32 dim 1 : vector<4x256xf32>, i32 -> vector<4x256xf32>
    %c6 = arith.constant 6 : index
    %c0_9 = arith.constant 0 : index
    %32 = vector.load %arg6[%c6, %c0_9] : memref<9x256xf32, #tpu.memory_space<vmem>>, vector<1x256xf32>
    %33 = vector.broadcast %32 : vector<1x256xf32> to vector<4x256xf32>
    %34 = arith.mulf %31, %33 : vector<4x256xf32>
    %35 = arith.truncf %34 : vector<4x256xf32> to vector<4x256xbf16>
    %c240_i32 = arith.constant 240 : i32
    %36 = tpu.dynamic_rotate %1 by %c240_i32 dim 1 : vector<4x256xf32>, i32 -> vector<4x256xf32>
    %c7 = arith.constant 7 : index
    %c0_10 = arith.constant 0 : index
    %37 = vector.load %arg6[%c7, %c0_10] : memref<9x256xf32, #tpu.memory_space<vmem>>, vector<1x256xf32>
    %38 = vector.broadcast %37 : vector<1x256xf32> to vector<4x256xf32>
    %39 = arith.mulf %36, %38 : vector<4x256xf32>
    %40 = arith.truncf %39 : vector<4x256xf32> to vector<4x256xbf16>
    %c239_i32 = arith.constant 239 : i32
    %41 = tpu.dynamic_rotate %1 by %c239_i32 dim 1 : vector<4x256xf32>, i32 -> vector<4x256xf32>
    %c8 = arith.constant 8 : index
    %c0_11 = arith.constant 0 : index
    %42 = vector.load %arg6[%c8, %c0_11] : memref<9x256xf32, #tpu.memory_space<vmem>>, vector<1x256xf32>
    %43 = vector.broadcast %42 : vector<1x256xf32> to vector<4x256xf32>
    %44 = arith.mulf %41, %43 : vector<4x256xf32>
    %45 = arith.truncf %44 : vector<4x256xf32> to vector<4x256xbf16>
    %46 = tpu.concatenate %6, %11, %16, %21, %25, %30, %35, %40, %45 in 0 : vector<4x256xbf16>, vector<4x256xbf16>, vector<4x256xbf16>, vector<4x256xbf16>, vector<4x256xbf16>, vector<4x256xbf16>, vector<4x256xbf16>, vector<4x256xbf16>, vector<4x256xbf16> -> vector<36x256xbf16>
    %c0_12 = arith.constant 0 : index
    %c0_13 = arith.constant 0 : index
    %47 = vector.load %arg2[%c0_12, %c0_13] : memref<32x36xbf16, #tpu.memory_space<vmem>>, vector<32x36xbf16>
    %cst = arith.constant dense<0.000000e+00> : vector<32x256xf32>
    %48 = tpu.matmul %47, %46, %cst {dimension_numbers = #tpu.dot_dimension_numbers<[1], [0], [0], [1], [0, 0, 1, 1], [], []>} : vector<32x36xbf16>, vector<36x256xbf16>, vector<32x256xf32> -> vector<32x256xf32>
    %c0_14 = arith.constant 0 : index
    %c0_15 = arith.constant 0 : index
    %49 = vector.load %arg3[%c0_14, %c0_15] : memref<32x1xf32, #tpu.memory_space<vmem>>, vector<32x1xf32>
    %50 = vector.broadcast %49 : vector<32x1xf32> to vector<32x256xf32>
    %51 = arith.addf %48, %50 : vector<32x256xf32>
    %cst_16 = arith.constant 0.000000e+00 : f32
    %52 = vector.broadcast %cst_16 : f32 to vector<32x256xf32>
    %53 = arith.maximumf %51, %52 : vector<32x256xf32>
    %c17_i32_17 = arith.constant 17 : i32
    %54 = tpu.dynamic_rotate %53 by %c17_i32_17 dim 1 : vector<32x256xf32>, i32 -> vector<32x256xf32>
    %c0_18 = arith.constant 0 : index
    %c0_19 = arith.constant 0 : index
    %55 = vector.load %arg6[%c0_18, %c0_19] : memref<9x256xf32, #tpu.memory_space<vmem>>, vector<1x256xf32>
    %56 = vector.broadcast %55 : vector<1x256xf32> to vector<32x256xf32>
    %57 = arith.mulf %54, %56 : vector<32x256xf32>
    %58 = arith.truncf %57 : vector<32x256xf32> to vector<32x256xbf16>
    %c16_i32_20 = arith.constant 16 : i32
    %59 = tpu.dynamic_rotate %53 by %c16_i32_20 dim 1 : vector<32x256xf32>, i32 -> vector<32x256xf32>
    %c1_21 = arith.constant 1 : index
    %c0_22 = arith.constant 0 : index
    %60 = vector.load %arg6[%c1_21, %c0_22] : memref<9x256xf32, #tpu.memory_space<vmem>>, vector<1x256xf32>
    %61 = vector.broadcast %60 : vector<1x256xf32> to vector<32x256xf32>
    %62 = arith.mulf %59, %61 : vector<32x256xf32>
    %63 = arith.truncf %62 : vector<32x256xf32> to vector<32x256xbf16>
    %c15_i32_23 = arith.constant 15 : i32
    %64 = tpu.dynamic_rotate %53 by %c15_i32_23 dim 1 : vector<32x256xf32>, i32 -> vector<32x256xf32>
    %c2_24 = arith.constant 2 : index
    %c0_25 = arith.constant 0 : index
    %65 = vector.load %arg6[%c2_24, %c0_25] : memref<9x256xf32, #tpu.memory_space<vmem>>, vector<1x256xf32>
    %66 = vector.broadcast %65 : vector<1x256xf32> to vector<32x256xf32>
    %67 = arith.mulf %64, %66 : vector<32x256xf32>
    %68 = arith.truncf %67 : vector<32x256xf32> to vector<32x256xbf16>
    %c1_i32_26 = arith.constant 1 : i32
    %69 = tpu.dynamic_rotate %53 by %c1_i32_26 dim 1 : vector<32x256xf32>, i32 -> vector<32x256xf32>
    %c3_27 = arith.constant 3 : index
    %c0_28 = arith.constant 0 : index
    %70 = vector.load %arg6[%c3_27, %c0_28] : memref<9x256xf32, #tpu.memory_space<vmem>>, vector<1x256xf32>
    %71 = vector.broadcast %70 : vector<1x256xf32> to vector<32x256xf32>
    %72 = arith.mulf %69, %71 : vector<32x256xf32>
    %73 = arith.truncf %72 : vector<32x256xf32> to vector<32x256xbf16>
    %c4_29 = arith.constant 4 : index
    %c0_30 = arith.constant 0 : index
    %74 = vector.load %arg6[%c4_29, %c0_30] : memref<9x256xf32, #tpu.memory_space<vmem>>, vector<1x256xf32>
    %75 = vector.broadcast %74 : vector<1x256xf32> to vector<32x256xf32>
    %76 = arith.mulf %53, %75 : vector<32x256xf32>
    %77 = arith.truncf %76 : vector<32x256xf32> to vector<32x256xbf16>
    %c255_i32_31 = arith.constant 255 : i32
    %78 = tpu.dynamic_rotate %53 by %c255_i32_31 dim 1 : vector<32x256xf32>, i32 -> vector<32x256xf32>
    %c5_32 = arith.constant 5 : index
    %c0_33 = arith.constant 0 : index
    %79 = vector.load %arg6[%c5_32, %c0_33] : memref<9x256xf32, #tpu.memory_space<vmem>>, vector<1x256xf32>
    %80 = vector.broadcast %79 : vector<1x256xf32> to vector<32x256xf32>
    %81 = arith.mulf %78, %80 : vector<32x256xf32>
    %82 = arith.truncf %81 : vector<32x256xf32> to vector<32x256xbf16>
    %c241_i32_34 = arith.constant 241 : i32
    %83 = tpu.dynamic_rotate %53 by %c241_i32_34 dim 1 : vector<32x256xf32>, i32 -> vector<32x256xf32>
    %c6_35 = arith.constant 6 : index
    %c0_36 = arith.constant 0 : index
    %84 = vector.load %arg6[%c6_35, %c0_36] : memref<9x256xf32, #tpu.memory_space<vmem>>, vector<1x256xf32>
    %85 = vector.broadcast %84 : vector<1x256xf32> to vector<32x256xf32>
    %86 = arith.mulf %83, %85 : vector<32x256xf32>
    %87 = arith.truncf %86 : vector<32x256xf32> to vector<32x256xbf16>
    %c240_i32_37 = arith.constant 240 : i32
    %88 = tpu.dynamic_rotate %53 by %c240_i32_37 dim 1 : vector<32x256xf32>, i32 -> vector<32x256xf32>
    %c7_38 = arith.constant 7 : index
    %c0_39 = arith.constant 0 : index
    %89 = vector.load %arg6[%c7_38, %c0_39] : memref<9x256xf32, #tpu.memory_space<vmem>>, vector<1x256xf32>
    %90 = vector.broadcast %89 : vector<1x256xf32> to vector<32x256xf32>
    %91 = arith.mulf %88, %90 : vector<32x256xf32>
    %92 = arith.truncf %91 : vector<32x256xf32> to vector<32x256xbf16>
    %c239_i32_40 = arith.constant 239 : i32
    %93 = tpu.dynamic_rotate %53 by %c239_i32_40 dim 1 : vector<32x256xf32>, i32 -> vector<32x256xf32>
    %c8_41 = arith.constant 8 : index
    %c0_42 = arith.constant 0 : index
    %94 = vector.load %arg6[%c8_41, %c0_42] : memref<9x256xf32, #tpu.memory_space<vmem>>, vector<1x256xf32>
    %95 = vector.broadcast %94 : vector<1x256xf32> to vector<32x256xf32>
    %96 = arith.mulf %93, %95 : vector<32x256xf32>
    %97 = arith.truncf %96 : vector<32x256xf32> to vector<32x256xbf16>
    %98 = tpu.concatenate %58, %63, %68, %73, %77, %82, %87, %92, %97 in 0 : vector<32x256xbf16>, vector<32x256xbf16>, vector<32x256xbf16>, vector<32x256xbf16>, vector<32x256xbf16>, vector<32x256xbf16>, vector<32x256xbf16>, vector<32x256xbf16>, vector<32x256xbf16> -> vector<288x256xbf16>
    %c0_43 = arith.constant 0 : index
    %c0_44 = arith.constant 0 : index
    %99 = vector.load %arg4[%c0_43, %c0_44] : memref<32x288xbf16, #tpu.memory_space<vmem>>, vector<32x288xbf16>
    %cst_45 = arith.constant dense<0.000000e+00> : vector<32x256xf32>
    %100 = tpu.matmul %99, %98, %cst_45 {dimension_numbers = #tpu.dot_dimension_numbers<[1], [0], [0], [1], [0, 0, 1, 1], [], []>} : vector<32x288xbf16>, vector<288x256xbf16>, vector<32x256xf32> -> vector<32x256xf32>
    %c0_46 = arith.constant 0 : index
    %c0_47 = arith.constant 0 : index
    %101 = vector.load %arg5[%c0_46, %c0_47] : memref<32x1xf32, #tpu.memory_space<vmem>>, vector<32x1xf32>
    %102 = vector.broadcast %101 : vector<32x1xf32> to vector<32x256xf32>
    %103 = arith.addf %100, %102 : vector<32x256xf32>
    %cst_48 = arith.constant 0.000000e+00 : f32
    %104 = vector.broadcast %cst_48 : f32 to vector<32x256xf32>
    %105 = arith.maximumf %103, %104 : vector<32x256xf32>
    %c0_49 = arith.constant 0 : index
    %c0_50 = arith.constant 0 : index
    %c0_51 = arith.constant 0 : index
    %106 = vector.load %arg7[%c0_49, %c0_50, %c0_51] : memref<1x32x256xf32, #tpu.memory_space<vmem>>, vector<1x32x256xf32>
    %107 = vector.shape_cast %106 : vector<1x32x256xf32> to vector<32x256xf32>
    %108 = vector.shape_cast %105 : vector<32x256xf32> to vector<1x32x256xf32>
    tpu.vector_store %arg7[%c0_49, %c0_50, %c0_51], %108 {strides = array<i32>} : memref<1x32x256xf32, #tpu.memory_space<vmem>>, vector<1x32x256xf32>,
    return
  }
  func.func @transform_0(%arg0: i32) -> (i32, i32, i32) {
    %c0_i32 = arith.constant 0 : i32
    %c0_i32_0 = arith.constant 0 : i32
    %c0_i32_1 = arith.constant 0 : i32
    return %arg0, %c0_i32, %c0_i32_0 : i32, i32, i32
  }
  func.func @transform_1(%arg0: i32) -> (i32, i32) {
    %c0_i32 = arith.constant 0 : i32
    %c0_i32_0 = arith.constant 0 : i32
    %c0_i32_1 = arith.constant 0 : i32
    return %c0_i32, %c0_i32_0 : i32, i32
  }
  func.func @transform_2(%arg0: i32) -> (i32, i32) {
    %c0_i32 = arith.constant 0 : i32
    %c0_i32_0 = arith.constant 0 : i32
    %c0_i32_1 = arith.constant 0 : i32
    return %c0_i32, %c0_i32_0 : i32, i32
  }
  func.func @transform_3(%arg0: i32) -> (i32, i32) {
    %c0_i32 = arith.constant 0 : i32
    %c0_i32_0 = arith.constant 0 : i32
    %c0_i32_1 = arith.constant 0 : i32
    return %c0_i32, %c0_i32_0 : i32, i32
  }
  func.func @transform_4(%arg0: i32) -> (i32, i32) {
    %c0_i32 = arith.constant 0 : i32
    %c0_i32_0 = arith.constant 0 : i32
    %c0_i32_1 = arith.constant 0 : i32
    return %c0_i32, %c0_i32_0 : i32, i32
  }
  func.func @transform_5(%arg0: i32) -> (i32, i32) {
    %c0_i32 = arith.constant 0 : i32
    %c0_i32_0 = arith.constant 0 : i32
    %c0_i32_1 = arith.constant 0 : i32
    return %c0_i32, %c0_i32_0 : i32, i32
  }
  func.func @transform_6(%arg0: i32) -> (i32, i32, i32) {
    %c0_i32 = arith.constant 0 : i32
    %c0_i32_0 = arith.constant 0 : i32
    %c0_i32_1 = arith.constant 0 : i32
    return %arg0, %c0_i32, %c0_i32_0 : i32, i32, i32
  }
}

</mosaic_0001>

<bundles_post_ra>
// kernel: convblock_forward.1
= control target key start
LH: loop header
LB: loop body
LE: loop exit
PB: predicated region body
PF: predicated region fallthrough
CT: control target
= control target key end

     0   :  { %s1520_s21 = smov 0   ;;  %s2330_s0 = inlined_call_operand.vmem [shape: f32[2,4,256], index: 0, kind: input, shape index: {}]   ;;  %s2331_s1 = inlined_call_operand.vmem [shape: bf16[32,36], index: 1, kind: input, shape index: {}]   ;;  %s2332_s2 = inlined_call_operand.vmem [shape: f32[32,1], index: 2, kind: input, shape index: {}]   ;;  %s2333_s3 = inlined_call_operand.vmem [shape: bf16[32,288], index: 3, kind: input, shape index: {}]   ;;  %s2334_s4 = inlined_call_operand.vmem [shape: f32[32,1], index: 4, kind: input, shape index: {}]   ;;  %s2335_s5 = inlined_call_operand.vmem [shape: f32[9,256], index: 5, kind: input, shape index: {}]   ;;  %s2336_s6 = inlined_call_operand.vmem [shape: f32[2,32,256], index: 6, kind: output, shape index: {}]  }
   0x1 LB: > { %s1369_s22 = sadd.s32 4294967295, %s1474_s21   ;;  %p1373_p0 = scmp.ge.s32.totalorder %s1474_s21, 1  ;;  %s1474_s21 = sphi %s1520_s21, %s16_s21  }
   0x2   : > { %p212_p1 = scmp.lt.s32.totalorder %s1474_s21, 3 }
   0x4   : > { %p213_p2 = pnand %p1373_p0, %p212_p1 }
   0x6   : > { %216 = sbr.rel (%p213_p2) target bundleno = 825 (0x339), region = 44 }
   0xb   : > { %p242_p3 = scmp.lt.s32.totalorder %s1369_s22, 1  ;;  %s1476_s27 = smov 17   ;;  %v1381_v3 = vld [vmem:[%s2335_s5 + $0x4] ss:$8 sm:$0x3]  ;;  %vm350_vm0 = vcmask 1043456   ;;  %v264_v30 = vlaneseq }
   0xc   : > { %s1477_s30 = smov 16   ;;  %v1541_v6 = vperm.slane %v1381_v3, 1  ;;  %v1543_v7 = vperm.slane %v1381_v3, 0  ;;  %s1478_s7 = smov 1   ;;  %vm502_vm9 = vcmask 1041408   ;;  %vm513_vm10 = vcmask 1045504  }
   0xd   : > { %s2363_s22 = smov (!%p242_p3, %s1369_s22), 1  ;;  %s1479_s8 = smov 127   ;;  %v1566_v32 = vand.u32 127, %v264_v30  ;;  %v1378_v35 = vld [vmem:[%s2335_s5 + $0x1] ss:$8 sm:$0x3] }
   0xe   : > { %s1428_s23 = sshll.u32 %s2363_s22, 3  ;;  %v349_v8 = vrot.slane %v1541_v6, 4  ;;  %s1480_s9 = smov 113   ;;  %v269_v36 = vld [vmem:[%s2335_s5] ss:$8 sm:$0x3] }
   0xf   : > { %s246_s26 = scalar_lea.vmem %s2330_s0, %s1428_s23  ;;  %s1481_s10 = smov 112   ;;  %vm287_vm1 = vcmp.lt.s32.totalorder %v1566_v32, 16  ;;  %v1575_v37 = vperm.slane %v1378_v35, 0  ;;  %v1577_v38 = vperm.slane %v1378_v35, 1  ;;  %vm266_vm2 = vcmp.lt.s32.totalorder %v1566_v32, 17 }
  0x10   : > { %v253_v0 = vld [vmem:[%s246_s26] sm:$0xff]  ;;  %v351_v11 = vsel %vm350_vm0, %v1543_v7, %v349_v8  ;;  %s1482_s11 = smov 15   ;;  %s1483_s12 = smov 111   ;;  %vm370_vm3 = vcmp.lt.s32.totalorder %v1566_v32, 127  ;;  %v1588_v43 = vperm.slane %v269_v36, 0  ;;  %v1590_v44 = vperm.slane %v269_v36, 1 }
  0x11   : > { %255 = vst [vmem:[#allocation1] ss:$2 sm:$0xff] %v253_v0  ;;  %v353_v12 = vmul.f32 %v351_v11, %v253_v0  ;;  %v1382_v39 = vld [vmem:[%s2335_s5 + $0x5] ss:$8 sm:$0x3]  ;;  %vm414_vm4 = vcmp.lt.s32.totalorder %v1566_v32, 112 }
  0x12   : > { %v1596_v47 = vperm.slane %v1382_v39, 0  ;;  %v1598_v48 = vperm.slane %v1382_v39, 1  ;;  %v1384_v53 = vld [vmem:[%s2335_s5 + $0x7] ss:$8 sm:$0x3]  ;;  %vm392_vm5 = vcmp.lt.s32.totalorder %v1566_v32, 113 }
  0x13   : > { %v1383_v60 = vld [vmem:[%s2335_s5 + $0x6] ss:$8 sm:$0x3]  ;;  %v1617_v62 = vperm.slane %v1384_v53, 0  ;;  %v1619_v63 = vperm.slane %v1384_v53, 1  ;;  %vm309_vm6 = vcmp.lt.s32.totalorder %v1566_v32, 15 }
  0x14   : > { %v1628_v3 = vperm.slane %v1383_v60, 0  ;;  %v540_v11 = vld [vmem:[%s2332_s2] sm:$0xff]  ;;  %vm436_vm7 = vcmp.lt.s32.totalorder %v1566_v32, 111  ;;  %vm331_vm8 = vcmp.lt.s32.totalorder %v1566_v32, 1  ;;  %vm574_vm11 = vcmask 293888   ;;  %s1429_s15 = sshll.u32 %s2363_s22, 6 }
  0x15   : > { %vm1177_vm12 = vcmask 261120   ;;  %s2317_s18 = scalar_lea.vmem %s2336_s6, %s1429_s15 }
  0x18   : > { %v256_v1 = vld.sshfl [vmem:[#allocation1] sm:$0xff pattern:$0x75316420]  ;;  %v257_v2 = vld.sshfl [vmem:[#allocation1 + $0x8] sm:$0xff pattern:$0x75316420] }
  0x19   : > { %278 = vst [vmem:[#allocation1] ss:$2 sm:$0xff] %v253_v0  ;;  %260 = vrot.lane.b32.xlu1 %v256_v1, %s1476_s27  ;;  %262 = vrot.lane.b32.xlu2 %v257_v2, %s1476_s27 }
  0x20   : > { %v280_v4 = vld.sshfl [vmem:[#allocation1 + $0x8] sm:$0xff pattern:$0x75316420]  ;;  %v279_v5 = vld.sshfl [vmem:[#allocation1] sm:$0xff pattern:$0x75316420] }
  0x21   : > { %285 = vrot.lane.b32.xlu0 %v280_v4, %s1477_s30  ;;  %300 = vst [vmem:[#allocation1] ss:$2 sm:$0xff] %v253_v0  ;;  %283 = vrot.lane.b32.xlu2 %v279_v5, %s1477_s30  ;;  %v1630_v4 = vperm.slane %v1383_v60, 1 }
  0x28   : > { %v301_v9 = vld.sshfl [vmem:[#allocation1] sm:$0xff pattern:$0x75316420]  ;;  %v302_v10 = vld.sshfl [vmem:[#allocation1 + $0x8] sm:$0xff pattern:$0x75316420] }
  0x29   : > { %322 = vst [vmem:[#allocation1] ss:$2 sm:$0xff] %v253_v0 }
  0x30   : > { %v323_v13 = vld.sshfl [vmem:[#allocation1] sm:$0xff pattern:$0x75316420]  ;;  %v324_v14 = vld.sshfl [vmem:[#allocation1 + $0x8] sm:$0xff pattern:$0x75316420] }
  0x31   : > { %327 = vrot.lane.b32.xlu0 %v323_v13, %s1478_s7  ;;  %355 = vst [vmem:[#allocation1] ss:$2 sm:$0xff] %v353_v12  ;;  %v542_v12 = vld [vmem:[%s2332_s2 + $0x10] sm:$0xff] }
  0x38   : > { %v1549_v15 = vld.sshfl [vmem:[#allocation1] sm:$0xff pattern:$0x75316420]  ;;  %v1551_v16 = vld.sshfl [vmem:[#allocation1 + $0x8] sm:$0xff pattern:$0x75316420] }
  0x39   : > { %361 = vst [vmem:[#allocation1] ss:$2 sm:$0xff] %v253_v0 }
  0x40   : > { %v362_v17 = vld.sshfl [vmem:[#allocation1] sm:$0xff pattern:$0x75316420]  ;;  %v363_v18 = vld.sshfl [vmem:[#allocation1 + $0x8] sm:$0xff pattern:$0x75316420] }
  0x41   : > { %366 = vrot.lane.b32.xlu0 %v362_v17, %s1479_s8  ;;  %383 = vst [vmem:[#allocation1] ss:$2 sm:$0xff] %v253_v0 }
  0x48   : > { %v385_v19 = vld.sshfl [vmem:[#allocation1 + $0x8] sm:$0xff pattern:$0x75316420]  ;;  %v384_v20 = vld.sshfl [vmem:[#allocation1] sm:$0xff pattern:$0x75316420] }
  0x49   : > { %368 = vrot.lane.b32.xlu0 %v363_v18, %s1479_s8  ;;  %390 = vrot.lane.b32.xlu1 %v385_v19, %s1480_s9  ;;  %405 = vst [vmem:[#allocation1] ss:$2 sm:$0xff] %v253_v0  ;;  %v1484_v18 = vmov 0   ;;  %v360_v19 = vpack.c.bf16 %v1551_v16, %v1549_v15  ;;  %v1379_v15 = vld [vmem:[%s2335_s5 + $0x2] ss:$8 sm:$0x3] }
  0x4a   : > { %1467 = vset.pattern.permute.xlu0 %v1484_v18  ;;  %1465 = vset.pattern.permute.xlu1 %v1484_v18  ;;  %v1664_v39 = vperm.slane %v1379_v15, 0 }
  0x4b   : > { %1466 = vset.pattern.permute.xlu2 %v1484_v18  ;;  %v474_v35 = vunpack.c.l.b16 %v360_v19 }
  0x50   : > { %v406_v21 = vld.sshfl [vmem:[#allocation1] sm:$0xff pattern:$0x75316420]  ;;  %v407_v22 = vld.sshfl [vmem:[#allocation1 + $0x8] sm:$0xff pattern:$0x75316420] }
  0x51   : > { %388 = vrot.lane.b32.xlu0 %v384_v20, %s1480_s9  ;;  %427 = vst [vmem:[#allocation1] ss:$2 sm:$0xff] %v253_v0  ;;  %410 = vrot.lane.b32.xlu2 %v406_v21, %s1481_s10 }
  0x58   : > { %v428_v23 = vld.sshfl [vmem:[#allocation1] sm:$0xff pattern:$0x75316420]  ;;  %v429_v24 = vld.sshfl [vmem:[#allocation1 + $0x8] sm:$0xff pattern:$0x75316420] }
  0x59   : > { %307 = vrot.lane.b32.xlu0 %v302_v10, %s1482_s11  ;;  %432 = vrot.lane.b32.xlu1 %v428_v23, %s1483_s12 }
  0x5a   : > { %412 = vrot.lane.b32.xlu2 %v407_v22, %s1481_s10  ;;  %v1385_v22 = vld [vmem:[%s2335_s5 + $0x10] ss:$8 sm:$0x3] }
  0x61   : > { %434 = vrot.lane.b32.xlu1 %v429_v24, %s1483_s12  ;;  %546 = vperm.xlu0 %1467, %v540_v11  }
  0x62   : > { %305 = vrot.lane.b32.xlu2 %v301_v9, %s1482_s11 }
  0x69   : > { %329 = vrot.lane.b32.xlu1 %v324_v14, %s1478_s7 }
  0x71   : > { %556 = vperm.xlu1 %1465, %v542_v12  }
  0x73   : > { %v263_v26 = vpop.permute.xlu2 %262 }
  0x7b   : > { %v284_v28 = vpop.permute.xlu2 %283 }
  0x8b   : > { %v261_v31 = vpop.permute.xlu1 %260 }
  0x8c   : > { %v267_v45 = vsel %vm266_vm2, %v261_v31, %v263_v26  ;;  %v268_v46 = vsel %vm266_vm2, %v263_v26, %v261_v31 }
  0x8d   : > { %v275_v54 = vmul.f32 %v1588_v43, %v268_v46  ;;  %v276_v55 = vmul.f32 %v1590_v44, %v267_v45 }
  0x8f   : > { %v1626_v2 = vpack.c.bf16 %v276_v55, %v275_v54 }
  0x91   : > { %v450_v24 = vunpack.c.l.b16 %v1626_v2 }
  0x93   : > { %v286_v25 = vpop.permute.xlu0 %285 }
  0x94   : > { %v288_v40 = vsel %vm287_vm1, %v284_v28, %v286_v25  ;;  %v289_v41 = vsel %vm287_vm1, %v286_v25, %v284_v28  ;;  %v451_v28 = vunpack.c.h.b16 %v1626_v2 }
  0x95   : > { %v297_v49 = vmul.f32 %v1575_v37, %v289_v41  ;;  %v298_v50 = vmul.f32 %v1577_v38, %v288_v40  ;;  %v1666_v40 = vperm.slane %v1379_v15, 1  ;;  %v475_v41 = vunpack.c.h.b16 %v360_v19 }
  0x97   : > { %v299_v61 = vpack.c.bf16 %v298_v50, %v297_v49  ;;  %v477_v11 = vpack.c.b16 %v475_v41, %v475_v41 }
  0x99   : > { %v455_v13 = vunpack.c.l.b16 %v299_v61  ;;  %v456_v23 = vunpack.c.h.b16 %v299_v61 }
  0x9b   : > { %v1655_v16 = vpack.c.b16 %v455_v13, %v455_v13 }
  0xa3   : > { %v1564_v27 = vpop.permute.xlu0 %327 }
  0xab   : > { %v411_v33 = vpop.permute.xlu2 %410 }
  0xb3   : > { %v367_v29 = vpop.permute.xlu0 %366 }
  0xb4   : > { %v413_v56 = vpop.permute.xlu2 %412 }
  0xb5   : > { %v415_v0 = vsel %vm414_vm4, %v411_v33, %v413_v56  ;;  %v416_v1 = vsel %vm414_vm4, %v413_v56, %v411_v33  ;;  %v1660_v33 = vperm.slane %v1385_v22, 0  ;;  %v1679_v56 = vpack.c.b16 %v456_v23, %v456_v23 }
  0xb6   : > { %v424_v14 = vmul.f32 %v1617_v62, %v415_v0  ;;  %v425_v17 = vmul.f32 %v1619_v63, %v416_v1 }
  0xb7   : > { %2344 = vst [vmem:[#allocation2_spill] sm:$0xff] %v1660_v33 }
  0xbb   : > { %v369_v34 = vpop.permute.xlu0 %368  ;;  %v391_v42 = vpop.permute.xlu1 %390 }
  0xbc   : > { %v371_v51 = vsel %vm370_vm3, %v367_v29, %v369_v34  ;;  %v372_v52 = vsel %vm370_vm3, %v369_v34, %v367_v29  ;;  %v426_v29 = vpack.c.bf16 %v425_v17, %v424_v14  ;;  %v306_v31 = vpop.permute.xlu2 %305  ;;  %v1662_v34 = vperm.slane %v1385_v22, 1 }
  0xbd   : > { %v380_v58 = vmul.f32 %v1596_v47, %v371_v51  ;;  %v381_v59 = vmul.f32 %v1598_v48, %v372_v52  ;;  %v541_v51 = vld [vmem:[%s2332_s2 + $0x8] sm:$0xff] }
  0xbe   : > { %2345 = vst [vmem:[#allocation3_spill] sm:$0xff] %v1662_v34  ;;  %v491_v54 = vunpack.c.l.b16 %v426_v29  ;;  %v492_v55 = vunpack.c.h.b16 %v426_v29  ;;  %551 = vperm.xlu1 %1465, %v541_v51  }
  0xbf   : > { %v382_v5 = vpack.c.bf16 %v381_v59, %v380_v58  ;;  %v476_v59 = vpack.c.b16 %v474_v35, %v474_v35 }
  0xc0   : > { %v493_v12 = vpack.c.b16 %v491_v54, %v491_v54  ;;  %v494_v13 = vpack.c.b16 %v492_v55, %v492_v55  ;;  %v459_v54 = vrot.slane %v1655_v16, 6  ;;  %v460_v55 = vrot.slane %v1679_v56, 6 }
  0xc1   : > { %v479_v25 = vunpack.c.l.b16 %v382_v5  ;;  %v480_v26 = vunpack.c.h.b16 %v382_v5  ;;  %v1380_v5 = vld [vmem:[%s2335_s5 + $0x3] ss:$8 sm:$0x3] }
  0xc2   : > { %v1689_v14 = vperm.slane %v1380_v5, 0  ;;  %v1691_v17 = vperm.slane %v1380_v5, 1  ;;  %v496_v41 = vrot.slane %v494_v13, 2  ;;  %v1430_v13 = vld [vmem:[%s2331_s1] sm:$0xff] }
  0xc3   : > { %v389_v57 = vpop.permute.xlu0 %388  ;;  %v482_v45 = vpack.c.b16 %v480_v26, %v480_v26 }
  0xc4   : > { %v393_v8 = vsel %vm392_vm5, %v389_v57, %v391_v42  ;;  %v394_v9 = vsel %vm392_vm5, %v391_v42, %v389_v57  ;;  %v481_v42 = vpack.c.b16 %v479_v25, %v479_v25 }
  0xc5   : > { %v402_v20 = vmul.f32 %v1628_v3, %v393_v8  ;;  %v403_v21 = vmul.f32 %v1630_v4, %v394_v9  ;;  %v484_v9 = vrot.slane %v482_v45, 6 }
  0xc6   : > { %v483_v8 = vrot.slane %v481_v42, 6 }
  0xc7   : > { %v404_v36 = vpack.c.bf16 %v403_v21, %v402_v20  ;;  %v525_v29 = vsel %vm502_vm9, %v477_v11, %v484_v9 }
  0xc8   : > { %v522_v15 = vsel %vm502_vm9, %v476_v59, %v483_v8 }
  0xc9   : > { %v486_v60 = vunpack.c.l.b16 %v404_v36  ;;  %v487_v61 = vunpack.c.h.b16 %v404_v36  ;;  %v495_v36 = vrot.slane %v493_v12, 2 }
  0xcb   : > { %v433_v10 = vpop.permute.xlu1 %432  ;;  %v308_v30 = vpop.permute.xlu0 %307  ;;  %v488_v21 = vpack.c.b16 %v486_v60, %v486_v60  ;;  %v489_v22 = vpack.c.b16 %v487_v61, %v487_v61 }
  0xcc   : > { %v310_v46 = vsel %vm309_vm6, %v306_v31, %v308_v30  ;;  %v311_v49 = vsel %vm309_vm6, %v308_v30, %v306_v31  ;;  %v543_v30 = vld [vmem:[%s2332_s2 + $0x18] sm:$0xff] }
  0xcd   : > { %v319_v0 = vmul.f32 %v1664_v39, %v311_v49  ;;  %v320_v1 = vmul.f32 %v1666_v40, %v310_v46  ;;  %561 = vperm.xlu2 %1466, %v543_v30  }
  0xcf   : > { %v321_v20 = vpack.c.bf16 %v320_v1, %v319_v0 }
  0xd1   : > { %v463_v51 = vunpack.c.h.b16 %v321_v20 }
  0xd3   : > { %v435_v50 = vpop.permute.xlu1 %434  ;;  %v465_v16 = vpack.c.b16 %v463_v51, %v463_v51 }
  0xd4   : > { %v437_v52 = vsel %vm436_vm7, %v433_v10, %v435_v50  ;;  %v438_v53 = vsel %vm436_vm7, %v435_v50, %v433_v10  ;;  %v462_v50 = vunpack.c.l.b16 %v321_v20 }
  0xd5   : > { %v446_v57 = vmul.f32 %v1660_v33, %v437_v52  ;;  %v447_v58 = vmul.f32 %v1662_v34, %v438_v53  ;;  %v527_v52 = vsel %vm350_vm0, %v522_v15, %v488_v21  ;;  %v529_v53 = vsel %vm350_vm0, %v525_v29, %v489_v22 }
  0xd6   : > { %v531_v59 = vsel %vm513_vm10, %v527_v52, %v495_v36  ;;  %v534_v60 = vsel %vm513_vm10, %v529_v53, %v496_v41  ;;  %v464_v1 = vpack.c.b16 %v462_v50, %v462_v50 }
  0xd7   : > { %v448_v10 = vpack.c.bf16 %v447_v58, %v446_v57  ;;  %v452_v57 = vpack.c.b16 %v450_v24, %v450_v24  ;;  %v453_v58 = vpack.c.b16 %v451_v28, %v451_v28 }
  0xd9   : > { %v498_v18 = vunpack.c.l.b16 %v448_v10  ;;  %v499_v19 = vunpack.c.h.b16 %v448_v10  ;;  %v505_v9 = vsel %vm502_vm9, %v452_v57, %v459_v54  ;;  %v508_v2 = vsel %vm502_vm9, %v453_v58, %v460_v55 }
  0xda   : > { %v510_v28 = vsel %vm350_vm0, %v505_v9, %v464_v1  ;;  %v512_v10 = vsel %vm350_vm0, %v508_v2, %v465_v16 }
  0xdb   : > { %v330_v23 = vpop.permute.xlu1 %329  ;;  %v500_v25 = vpack.c.b16 %v498_v18, %v498_v18  ;;  %v501_v26 = vpack.c.b16 %v499_v19, %v499_v19  ;;  %v1431_v18 = vld [vmem:[%s2331_s1 + $0x8] sm:$0xff]  ;;  %v547_v19 = vpop.permute.xlu0 %546 }
  0xdc   : > { %v332_v31 = vsel %vm331_vm8, %v1564_v27, %v330_v23  ;;  %v333_v35 = vsel %vm331_vm8, %v330_v23, %v1564_v27 }
  0xdd   : > { %v341_v42 = vmul.f32 %v1689_v14, %v333_v35  ;;  %v342_v45 = vmul.f32 %v1691_v17, %v332_v31  ;;  %v582_v46 = vsel %vm502_vm9, %v500_v25, 0  ;;  %v585_v49 = vsel %vm502_vm9, %v501_v26, 0 }
  0xde   : > { %592 = vmatpush.bf16.msra.mxu0 %v582_v46  ;;  %611 = vmatpush.bf16.msra.mxu1 %v585_v49 }
  0xdf   : > { %v343_v27 = vpack.c.bf16 %v342_v45, %v341_v42 }
  0xe1   : > { %v467_v61 = vunpack.c.l.b16 %v343_v27  ;;  %v468_v0 = vunpack.c.h.b16 %v343_v27 }
  0xe2   : > { %593 = vmatpush.bf16.msra.mxu0 %v531_v59  ;;  %612 = vmatpush.bf16.msra.mxu1 %v534_v60 }
  0xe3   : > { %v469_v5 = vpack.c.b16 %v467_v61, %v467_v61  ;;  %v470_v56 = vpack.c.b16 %v468_v0, %v468_v0  ;;  %v557_v15 = vpop.permute.xlu1 %556 }
  0xe5   : > { %v471_v8 = vrot.slane %v469_v5, 2  ;;  %v472_v24 = vrot.slane %v470_v56, 2 }
  0xe7   : > { %v515_v11 = vsel %vm513_vm10, %v510_v28, %v471_v8  ;;  %v518_v12 = vsel %vm513_vm10, %v512_v10, %v472_v24 }
  0xe8   : > { %594 = vmatpush.bf16.msra.mxu0 %v515_v11  ;;  %613 = vmatpush.bf16.msra.mxu1 %v518_v12 }
  0xeb   : > { %1394 = vmatmul.msk.bf16.vlgmr.msra.gmra.mxu0 %vm574_vm11, %v1430_v13  ;;  %1396 = vmatmul.msk.bf16.vlgmr.msra.gmra.mxu1 %vm574_vm11, %v1430_v13 }
  0xfb   : > { %1395 = vmatmul.msk.bf16.gmra.mxu0 %vm574_vm11, %v1431_v18  ;;  %1397 = vmatmul.msk.bf16.gmra.mxu1 %vm574_vm11, %v1431_v18 }
 0x127   : > { %v562_v53 = vpop.permute.xlu2 %561 }
 0x130   : > { %v552_v29 = vpop.permute.xlu1 %551 }
 0x168   : > { %v596_v20 = vpop.f32.mrf.mxu0  ;;  %v615_v21 = vpop.f32.mrf.mxu1 }
 0x169   : > { %v597_v22 = vadd.f32 %v596_v20, %v547_v19  ;;  %v616_v23 = vadd.f32 %v615_v21, %v547_v19 }
 0x16b   : > { %v1732_v25 = vmax.f32 %v597_v22, 0.0  ;;  %v1734_v26 = vmax.f32 %v616_v23, 0.0 }
 0x16d   : > { %749 = vrot.lane.b32.xlu1 %v1734_v26, %s1478_s7  ;;  %863 = vrot.lane.b32.xlu0 %v1732_v25, %s1481_s10 }
 0x16e   : > { %741 = vrot.lane.b32.xlu2 %v1732_v25, %s1478_s7 }
 0x170   : > { %v617_v30 = vpop.f32.mrf.mxu1  ;;  %v598_v35 = vpop.f32.mrf.mxu0 }
 0x171   : > { %v618_v31 = vadd.f32 %v617_v30, %v552_v29  ;;  %v599_v41 = vadd.f32 %v598_v35, %v552_v29 }
 0x173   : > { %v1760_v36 = vmax.f32 %v618_v31, 0.0  ;;  %v1768_v42 = vmax.f32 %v599_v41, 0.0 }
 0x175   : > { %827 = vrot.lane.b32.xlu1 %v1732_v25, %s1480_s9  ;;  %705 = vrot.lane.b32.xlu0 %v1732_v25, %s1482_s11 }
 0x176   : > { %871 = vrot.lane.b32.xlu2 %v1734_v26, %s1481_s10 }
 0x178   : > { %v620_v45 = vpop.f32.mrf.mxu1  ;;  %v601_v46 = vpop.f32.mrf.mxu0 }
 0x179   : > { %v621_v49 = vadd.f32 %v620_v45, %v557_v15  ;;  %v602_v50 = vadd.f32 %v601_v46, %v557_v15 }
 0x17b   : > { %v1794_v51 = vmax.f32 %v621_v49, 0.0  ;;  %v1796_v52 = vmax.f32 %v602_v50, 0.0 }
 0x17d   : > { %669 = vrot.lane.b32.xlu1 %v1732_v25, %s1477_s30  ;;  %835 = vrot.lane.b32.xlu0 %v1734_v26, %s1480_s9 }
 0x17e   : > { %713 = vrot.lane.b32.xlu2 %v1734_v26, %s1482_s11 }
 0x180   : > { %v622_v54 = vpop.f32.mrf.mxu1  ;;  %v603_v59 = vpop.f32.mrf.mxu0 }
 0x181   : > { %v623_v55 = vadd.f32 %v622_v54, %v562_v53  ;;  %v604_v60 = vadd.f32 %v603_v59, %v562_v53 }
 0x183   : > { %v1822_v58 = vmax.f32 %v623_v55, 0.0  ;;  %v1830_v0 = vmax.f32 %v604_v60, 0.0 }
 0x185   : > { %799 = vrot.lane.b32.xlu1 %v1734_v26, %s1479_s8  ;;  %677 = vrot.lane.b32.xlu0 %v1734_v26, %s1477_s30 }
 0x186   : > { %791 = vrot.lane.b32.xlu2 %v1732_v25, %s1479_s8 }
 0x18d   : > { %633 = vrot.lane.b32.xlu1 %v1732_v25, %s1476_s27  ;;  %641 = vrot.lane.b32.xlu0 %v1734_v26, %s1476_s27 }
 0x18e   : > { %751 = vrot.lane.b32.xlu2 %v1760_v36, %s1478_s7 }
 0x195   : > { %865 = vrot.lane.b32.xlu1 %v1768_v42, %s1481_s10  ;;  %743 = vrot.lane.b32.xlu0 %v1768_v42, %s1478_s7 }
 0x196   : > { %829 = vrot.lane.b32.xlu2 %v1768_v42, %s1480_s9 }
 0x19d   : > { %707 = vrot.lane.b32.xlu1 %v1768_v42, %s1482_s11  ;;  %873 = vrot.lane.b32.xlu0 %v1760_v36, %s1481_s10 }
 0x19e   : > { %671 = vrot.lane.b32.xlu2 %v1768_v42, %s1477_s30 }
 0x1a5   : > { %837 = vrot.lane.b32.xlu1 %v1760_v36, %s1480_s9  ;;  %715 = vrot.lane.b32.xlu0 %v1760_v36, %s1482_s11 }
 0x1a6   : > { %801 = vrot.lane.b32.xlu2 %v1760_v36, %s1479_s8 }
 0x1ad   : > { %679 = vrot.lane.b32.xlu1 %v1760_v36, %s1477_s30  ;;  %793 = vrot.lane.b32.xlu0 %v1768_v42, %s1479_s8 }
 0x1ae   : > { %635 = vrot.lane.b32.xlu2 %v1768_v42, %s1476_s27 }
 0x1b5   : > { %643 = vrot.lane.b32.xlu1 %v1760_v36, %s1476_s27  ;;  %875 = vrot.lane.b32.xlu0 %v1794_v51, %s1481_s10 }
 0x1b6   : > { %745 = vrot.lane.b32.xlu2 %v1796_v52, %s1478_s7 }
 0x1bd   : > { %867 = vrot.lane.b32.xlu1 %v1796_v52, %s1481_s10  ;;  %717 = vrot.lane.b32.xlu0 %v1794_v51, %s1482_s11 }
 0x1be   : > { %753 = vrot.lane.b32.xlu2 %v1794_v51, %s1478_s7 }
 0x1c5   : > { %709 = vrot.lane.b32.xlu1 %v1796_v52, %s1482_s11  ;;  %795 = vrot.lane.b32.xlu0 %v1796_v52, %s1479_s8 }
 0x1c6   : > { %831 = vrot.lane.b32.xlu2 %v1796_v52, %s1480_s9 }
 0x1c8   : > { %v742_v27 = vpop.permute.xlu2 %741 }
 0x1cd   : > { %839 = vrot.lane.b32.xlu1 %v1794_v51, %s1480_s9  ;;  %637 = vrot.lane.b32.xlu0 %v1796_v52, %s1476_s27 }
 0x1ce   : > { %673 = vrot.lane.b32.xlu2 %v1796_v52, %s1477_s30 }
 0x1d0   : > { %v872_v57 = vpop.permute.xlu2 %871 }
 0x1d5   : > { %681 = vrot.lane.b32.xlu1 %v1794_v51, %s1477_s30  ;;  %755 = vrot.lane.b32.xlu0 %v1822_v58, %s1478_s7 }
 0x1d6   : > { %803 = vrot.lane.b32.xlu2 %v1794_v51, %s1479_s8 }
 0x1d8   : > { %v714_v61 = vpop.permute.xlu2 %713 }
 0x1dd   : > { %747 = vrot.lane.b32.xlu1 %v1830_v0, %s1478_s7  ;;  %833 = vrot.lane.b32.xlu0 %v1830_v0, %s1480_s9 }
 0x1de   : > { %645 = vrot.lane.b32.xlu2 %v1794_v51, %s1476_s27 }
 0x1df   : > { %v750_v1 = vpop.permute.xlu1 %749  ;;  %v864_v16 = vpop.permute.xlu0 %863 }
 0x1e0   : > { %v757_v5 = vsel %vm331_vm8, %v742_v27, %v750_v1  ;;  %v761_v56 = vsel %vm331_vm8, %v750_v1, %v742_v27  ;;  %v879_v8 = vsel %vm414_vm4, %v864_v16, %v872_v57  ;;  %v883_v9 = vsel %vm414_vm4, %v872_v57, %v864_v16  ;;  %v792_v24 = vpop.permute.xlu2 %791 }
 0x1e1   : > { %v765_v2 = vmul.f32 %v761_v56, %v1689_v14  ;;  %v766_v28 = vmul.f32 %v757_v5, %v1691_v17  ;;  %v887_v10 = vmul.f32 %v879_v8, %v1617_v62  ;;  %v888_v11 = vmul.f32 %v883_v9, %v1619_v63 }
 0x1e3   : > { %v1850_v12 = vpack.c.bf16 %v766_v28, %v765_v2  ;;  %v1852_v13 = vpack.c.bf16 %v888_v11, %v887_v10 }
 0x1e5   : > { %877 = vrot.lane.b32.xlu1 %v1822_v58, %s1481_s10  ;;  %675 = vrot.lane.b32.xlu0 %v1830_v0, %s1477_s30 }
 0x1e6   : > { %869 = vrot.lane.b32.xlu2 %v1830_v0, %s1481_s10 }
 0x1e7   : > { %v828_v18 = vpop.permute.xlu1 %827  ;;  %v706_v19 = vpop.permute.xlu0 %705 }
 0x1e8   : > { %v721_v20 = vsel %vm309_vm6, %v706_v19, %v714_v61  ;;  %v725_v21 = vsel %vm309_vm6, %v714_v61, %v706_v19  ;;  %v752_v22 = vpop.permute.xlu2 %751 }
 0x1e9   : > { %v729_v23 = vmul.f32 %v725_v21, %v1664_v39  ;;  %v730_v15 = vmul.f32 %v721_v20, %v1666_v40 }
 0x1eb   : > { %v1866_v29 = vpack.c.bf16 %v730_v15, %v729_v23 }
 0x1ed   : > { %719 = vrot.lane.b32.xlu1 %v1822_v58, %s1482_s11  ;;  %805 = vrot.lane.b32.xlu0 %v1822_v58, %s1479_s8 }
 0x1ee   : > { %711 = vrot.lane.b32.xlu2 %v1830_v0, %s1482_s11 }
 0x1ef   : > { %v670_v30 = vpop.permute.xlu1 %669  ;;  %v836_v31 = vpop.permute.xlu0 %835 }
 0x1f0   : > { %v843_v35 = vsel %vm392_vm5, %v828_v18, %v836_v31  ;;  %v847_v41 = vsel %vm392_vm5, %v836_v31, %v828_v18  ;;  %v1878_v45 = vpop.permute.xlu2 %829 }
 0x1f1   : > { %v851_v46 = vmul.f32 %v843_v35, %v1628_v3  ;;  %v852_v49 = vmul.f32 %v847_v41, %v1630_v4 }
 0x1f3   : > { %v1882_v50 = vpack.c.bf16 %v852_v49, %v851_v46  ;;  %v999_v46 = vunpack.c.l.b16 %v1850_v12 }
 0x1f5   : > { %797 = vrot.lane.b32.xlu1 %v1830_v0, %s1479_s8  ;;  %899 = vrot.lane.b32.xlu0 %v1732_v25, %s1483_s12 }
 0x1f6   : > { %841 = vrot.lane.b32.xlu2 %v1822_v58, %s1480_s9 }
 0x1f7   : > { %v800_v53 = vpop.permute.xlu1 %799  ;;  %v678_v27 = vpop.permute.xlu0 %677 }
 0x1f8   : > { %v807_v54 = vsel %vm370_vm3, %v792_v24, %v800_v53  ;;  %v811_v55 = vsel %vm370_vm3, %v800_v53, %v792_v24  ;;  %v685_v57 = vsel %vm287_vm1, %v670_v30, %v678_v27  ;;  %v689_v59 = vsel %vm287_vm1, %v678_v27, %v670_v30  ;;  %v1898_v60 = vpop.permute.xlu2 %671 }
 0x1f9   : > { %v815_v61 = vmul.f32 %v807_v54, %v1596_v47  ;;  %v816_v1 = vmul.f32 %v811_v55, %v1598_v48  ;;  %v693_v16 = vmul.f32 %v689_v59, %v1575_v37  ;;  %v694_v5 = vmul.f32 %v685_v57, %v1577_v38 }
 0x1fa   : > { %v1000_v53 = vunpack.c.h.b16 %v1850_v12 }
 0x1fb   : > { %v1904_v56 = vpack.c.bf16 %v816_v1, %v815_v61  ;;  %v1906_v8 = vpack.c.bf16 %v694_v5, %v693_v16  ;;  %v1123_v5 = vld [vmem:[%s2334_s4] sm:$0xff] }
 0x1fd   : > { %639 = vrot.lane.b32.xlu1 %v1830_v0, %s1476_s27  ;;  %647 = vrot.lane.b32.xlu0 %v1822_v58, %s1476_s27 }
 0x1fe   : > { %683 = vrot.lane.b32.xlu2 %v1822_v58, %s1477_s30 }
 0x1ff   : > { %v634_v9 = vpop.permute.xlu1 %633  ;;  %v642_v24 = vpop.permute.xlu0 %641 }
 0x200   : > { %v649_v2 = vsel %vm266_vm2, %v634_v9, %v642_v24  ;;  %v653_v28 = vsel %vm266_vm2, %v642_v24, %v634_v9  ;;  %v1918_v10 = vpop.permute.xlu2 %801  ;;  %v1125_v9 = vld [vmem:[%s2334_s4 + $0x10] sm:$0xff] }
 0x201   : > { %v657_v11 = vmul.f32 %v653_v28, %v1588_v43  ;;  %v658_v18 = vmul.f32 %v649_v2, %v1590_v44  ;;  %v1079_v2 = vunpack.c.l.b16 %v1852_v13 }
 0x203   : > { %v1922_v19 = vpack.c.bf16 %v658_v18, %v657_v11  ;;  %v1080_v11 = vunpack.c.h.b16 %v1852_v13 }
 0x205   : > { %911 = vrot.lane.b32.xlu1 %v1794_v51, %s1483_s12  ;;  %905 = vrot.lane.b32.xlu0 %v1830_v0, %s1483_s12 }
 0x206   : > { %903 = vrot.lane.b32.xlu2 %v1796_v52, %s1483_s12 }
 0x207   : > { %v866_v20 = vpop.permute.xlu1 %865  ;;  %v744_v21 = vpop.permute.xlu0 %743 }
 0x208   : > { %v758_v23 = vsel %vm331_vm8, %v744_v21, %v752_v22  ;;  %v762_v15 = vsel %vm331_vm8, %v752_v22, %v744_v21  ;;  %v1934_v30 = vpop.permute.xlu2 %635 }
 0x209   : > { %v767_v31 = vmul.f32 %v762_v15, %v1689_v14  ;;  %v768_v35 = vmul.f32 %v758_v23, %v1691_v17 }
 0x20b   : > { %v774_v41 = vpack.c.bf16 %v768_v35, %v767_v31 }
 0x20d   : > { %901 = vrot.lane.b32.xlu1 %v1768_v42, %s1483_s12  ;;  %909 = vrot.lane.b32.xlu0 %v1760_v36, %s1483_s12  ;;  %v1001_v49 = vunpack.c.l.b16 %v774_v41  ;;  %v1002_v27 = vunpack.c.h.b16 %v774_v41 }
 0x20e   : > { %913 = vrot.lane.b32.xlu2 %v1822_v58, %s1483_s12 }
 0x20f   : > { %v708_v22 = vpop.permute.xlu1 %707  ;;  %v874_v54 = vpop.permute.xlu0 %873  ;;  %v1946_v55 = vpack.c.b16 %v1001_v49, %v999_v46  ;;  %v1948_v57 = vpack.c.b16 %v1002_v27, %v1000_v53 }
 0x210   : > { %v880_v59 = vsel %vm414_vm4, %v866_v20, %v874_v54  ;;  %v884_v61 = vsel %vm414_vm4, %v874_v54, %v866_v20  ;;  %v1954_v1 = vpop.permute.xlu2 %745 }
 0x211   : > { %v889_v12 = vmul.f32 %v880_v59, %v1617_v62  ;;  %v890_v16 = vmul.f32 %v884_v61, %v1619_v63 }
 0x213   : > { %v896_v24 = vpack.c.bf16 %v890_v16, %v889_v12  ;;  %v979_v12 = vunpack.c.l.b16 %v1866_v29 }
 0x215   : > { %1129 = vperm.xlu1 %1465, %v1123_v5   ;;  %1139 = vperm.xlu0 %1467, %v1125_v9   ;;  %v1081_v28 = vunpack.c.l.b16 %v896_v24  ;;  %v1082_v18 = vunpack.c.h.b16 %v896_v24  ;;  %v1059_v5 = vunpack.c.l.b16 %v1882_v50 }
 0x216   : > { %907 = vrot.lane.b32.xlu2 %v1734_v26, %s1483_s12 }
 0x217   : > { %v838_v20 = vpop.permute.xlu1 %837  ;;  %v716_v21 = vpop.permute.xlu0 %715  ;;  %v1968_v23 = vpack.c.b16 %v1081_v28, %v1079_v2  ;;  %v1970_v15 = vpack.c.b16 %v1082_v18, %v1080_v11 }
 0x218   : > { %v844_v31 = vsel %vm392_vm5, %v1878_v45, %v838_v20  ;;  %v848_v35 = vsel %vm392_vm5, %v838_v20, %v1878_v45  ;;  %v722_v13 = vsel %vm309_vm6, %v708_v22, %v716_v21  ;;  %v726_v41 = vsel %vm309_vm6, %v716_v21, %v708_v22  ;;  %v1982_v46 = vpop.permute.xlu2 %753  ;;  %v1126_v45 = vld [vmem:[%s2334_s4 + $0x18] sm:$0xff]  ;;  %v1124_v22 = vld [vmem:[%s2334_s4 + $0x8] sm:$0xff] }
 0x219   : > { %2346 = vst [vmem:[#allocation4_spill] sm:$0xff] %v1970_v15  ;;  %v853_v49 = vmul.f32 %v844_v31, %v1628_v3  ;;  %v854_v53 = vmul.f32 %v848_v35, %v1630_v4  ;;  %v731_v27 = vmul.f32 %v726_v41, %v1664_v39  ;;  %v732_v54 = vmul.f32 %v722_v13, %v1666_v40 }
 0x21a   : > { %v980_v21 = vunpack.c.h.b16 %v1866_v29  ;;  %v1060_v31 = vunpack.c.h.b16 %v1882_v50 }
 0x21b   : > { %v860_v59 = vpack.c.bf16 %v854_v53, %v853_v49  ;;  %v738_v61 = vpack.c.bf16 %v732_v54, %v731_v27 }
 0x21d   : > { %1144 = vperm.xlu1 %1465, %v1126_v45   ;;  %v981_v16 = vunpack.c.l.b16 %v738_v61  ;;  %v1061_v9 = vunpack.c.l.b16 %v860_v59  ;;  %v982_v24 = vunpack.c.h.b16 %v738_v61  ;;  %v1062_v2 = vunpack.c.h.b16 %v860_v59 }
 0x21e   : > { %1134 = vperm.xlu2 %1466, %v1124_v22   ;;  %v959_v22 = vunpack.c.l.b16 %v1906_v8 }
 0x21f   : > { %v680_v28 = vpop.permute.xlu1 %679  ;;  %v794_v11 = vpop.permute.xlu0 %793  ;;  %v1996_v18 = vpack.c.b16 %v981_v16, %v979_v12  ;;  %v1998_v20 = vpack.c.b16 %v1061_v9, %v1059_v5  ;;  %v2020_v45 = vpack.c.b16 %v982_v24, %v980_v21  ;;  %v960_v12 = vunpack.c.h.b16 %v1906_v8 }
 0x220   : > { %v686_v35 = vsel %vm287_vm1, %v1898_v60, %v680_v28  ;;  %v690_v13 = vsel %vm287_vm1, %v680_v28, %v1898_v60  ;;  %v808_v41 = vsel %vm370_vm3, %v794_v11, %v1918_v10  ;;  %v812_v49 = vsel %vm370_vm3, %v1918_v10, %v794_v11  ;;  %v2014_v53 = vpop.permute.xlu2 %831 }
 0x221   : > { %v695_v29 = vmul.f32 %v690_v13, %v1575_v37  ;;  %v696_v50 = vmul.f32 %v686_v35, %v1577_v38  ;;  %v817_v27 = vmul.f32 %v808_v41, %v1596_v47  ;;  %v818_v54 = vmul.f32 %v812_v49, %v1598_v48 }
 0x222   : > { %v2022_v60 = vpack.c.b16 %v1062_v2, %v1060_v31  ;;  %v1039_v10 = vunpack.c.l.b16 %v1904_v56  ;;  %v1040_v16 = vunpack.c.h.b16 %v1904_v56 }
 0x223   : > { %v702_v59 = vpack.c.bf16 %v696_v50, %v695_v29  ;;  %v824_v61 = vpack.c.bf16 %v818_v54, %v817_v27  ;;  %v939_v27 = vunpack.c.l.b16 %v1922_v19 }
 0x224   : > { %2347 = vst [vmem:[#allocation5_spill] sm:$0xff] %v2022_v60 }
 0x225   : > { %v961_v5 = vunpack.c.l.b16 %v702_v59  ;;  %v1041_v9 = vunpack.c.l.b16 %v824_v61  ;;  %v962_v28 = vunpack.c.h.b16 %v702_v59  ;;  %v1042_v11 = vunpack.c.h.b16 %v824_v61 }
 0x226   : > { %v940_v59 = vunpack.c.h.b16 %v1922_v19 }
 0x227   : > { %v644_v35 = vpop.permute.xlu1 %643  ;;  %v876_v13 = vpop.permute.xlu0 %875  ;;  %v2028_v24 = vpack.c.b16 %v961_v5, %v959_v22  ;;  %v2030_v2 = vpack.c.b16 %v1041_v9, %v1039_v10  ;;  %v2032_v21 = vpack.c.b16 %v962_v28, %v960_v12  ;;  %v2034_v31 = vpack.c.b16 %v1042_v11, %v1040_v16 }
 0x228   : > { %v650_v8 = vsel %vm266_vm2, %v1934_v30, %v644_v35  ;;  %v654_v56 = vsel %vm266_vm2, %v644_v35, %v1934_v30  ;;  %v2042_v41 = vpop.permute.xlu2 %673 }
 0x229   : > { %2348 = vst [vmem:[#allocation6_spill] sm:$0xff] %v2030_v2  ;;  %v659_v49 = vmul.f32 %v654_v56, %v1588_v43  ;;  %v660_v29 = vmul.f32 %v650_v8, %v1590_v44 }
 0x22a   : > { %2349 = vst [vmem:[#allocation7_spill] sm:$0xff] %v2032_v21 }
 0x22b   : > { %2350 = vst [vmem:[#allocation8_spill] sm:$0xff] %v2034_v31  ;;  %v666_v50 = vpack.c.bf16 %v660_v29, %v659_v49  ;;  %v759_v29 = vsel %vm331_vm8, %v1954_v1, %v1982_v46 }
 0x22d   : > { %v941_v54 = vunpack.c.l.b16 %v666_v50  ;;  %v942_v61 = vunpack.c.h.b16 %v666_v50  ;;  %v763_v50 = vsel %vm331_vm8, %v1982_v46, %v1954_v1 }
 0x22f   : > { %v868_v22 = vpop.permute.xlu1 %867  ;;  %v718_v10 = vpop.permute.xlu0 %717  ;;  %v2048_v12 = vpack.c.b16 %v941_v54, %v939_v27  ;;  %v2050_v16 = vpack.c.b16 %v942_v61, %v940_v59  ;;  %v769_v27 = vmul.f32 %v763_v50, %v1689_v14  ;;  %v770_v54 = vmul.f32 %v759_v29, %v1691_v17 }
 0x230   : > { %v2052_v30 = vpop.permute.xlu2 %803  ;;  %v881_v1 = vsel %vm414_vm4, %v868_v22, %v876_v13  ;;  %v885_v46 = vsel %vm414_vm4, %v876_v13, %v868_v22 }
 0x231   : > { %2351 = vst [vmem:[#allocation9_spill] sm:$0xff] %v2048_v12  ;;  %v891_v21 = vmul.f32 %v881_v1, %v1617_v62  ;;  %v892_v2 = vmul.f32 %v885_v46, %v1619_v63 }
 0x232   : > { %2352 = vst [vmem:[#allocation10_spill] sm:$0xff] %v2050_v16  ;;  %v775_v16 = vpack.c.bf16 %v770_v54, %v769_v27 }
 0x234   : > { %v1003_v50 = vunpack.c.l.b16 %v775_v16  ;;  %v1004_v33 = vunpack.c.h.b16 %v775_v16 }
 0x237   : > { %v710_v5 = vpop.permute.xlu1 %709  ;;  %v2054_v9 = vpop.permute.xlu0 %795 }
 0x238   : > { %v2056_v28 = vpop.permute.xlu2 %645 }
 0x23f   : > { %v840_v11 = vpop.permute.xlu1 %839  ;;  %v2058_v35 = vpop.permute.xlu0 %637 }
 0x240   : > { %v870_v8 = vpop.permute.xlu2 %869 }
 0x247   : > { %v2060_v56 = vpop.permute.xlu1 %681  ;;  %v756_v19 = vpop.permute.xlu0 %755 }
 0x248   : > { %v712_v49 = vpop.permute.xlu2 %711 }
 0x24f   : > { %v748_v59 = vpop.permute.xlu1 %747  ;;  %v834_v61 = vpop.permute.xlu0 %833 }
 0x250   : > { %v760_v31 = vsel %vm331_vm8, %v748_v59, %v756_v19  ;;  %v764_v60 = vsel %vm331_vm8, %v756_v19, %v748_v59  ;;  %v842_v15 = vpop.permute.xlu2 %841 }
 0x251   : > { %v771_v12 = vmul.f32 %v764_v60, %v1689_v14  ;;  %v772_v34 = vmul.f32 %v760_v31, %v1691_v17  ;;  %v723_v14 = vsel %vm309_vm6, %v710_v5, %v718_v10  ;;  %v727_v17 = vsel %vm309_vm6, %v718_v10, %v710_v5 }
 0x252   : > { %v845_v60 = vsel %vm392_vm5, %v2014_v53, %v840_v11  ;;  %v846_v16 = vsel %vm392_vm5, %v834_v61, %v842_v15  ;;  %v850_v27 = vsel %vm392_vm5, %v842_v15, %v834_v61  ;;  %v734_v46 = vmul.f32 %v723_v14, %v1666_v40 }
 0x253   : > { %v776_v29 = vpack.c.bf16 %v772_v34, %v771_v12  ;;  %v849_v34 = vsel %vm392_vm5, %v840_v11, %v2014_v53  ;;  %v2104_v11 = vpack.c.bf16 %v892_v2, %v891_v21  ;;  %v855_v15 = vmul.f32 %v845_v60, %v1628_v3 }
 0x254   : > { %v856_v61 = vmul.f32 %v849_v34, %v1630_v4  ;;  %v809_v2 = vsel %vm370_vm3, %v2054_v9, %v2052_v30 }
 0x255   : > { %v1005_v19 = vunpack.c.l.b16 %v776_v29  ;;  %v1006_v59 = vunpack.c.h.b16 %v776_v29  ;;  %v857_v29 = vmul.f32 %v846_v16, %v1628_v3  ;;  %v687_v16 = vsel %vm287_vm1, %v2042_v41, %v2060_v56 }
 0x257   : > { %v878_v13 = vpop.permute.xlu1 %877  ;;  %v676_v31 = vpop.permute.xlu0 %675  ;;  %v1009_v22 = vpack.c.b16 %v1005_v19, %v1003_v50  ;;  %v1010_v12 = vpack.c.b16 %v1006_v59, %v1004_v33  ;;  %v733_v33 = vmul.f32 %v727_v17, %v1664_v39  ;;  %v2122_v19 = vpack.c.bf16 %v856_v61, %v855_v15 }
 0x258   : > { %v882_v10 = vsel %vm414_vm4, %v870_v8, %v878_v13  ;;  %v886_v5 = vsel %vm414_vm4, %v878_v13, %v870_v8  ;;  %v684_v54 = vpop.permute.xlu2 %683  ;;  %v858_v8 = vmul.f32 %v850_v27, %v1630_v4  ;;  %v813_v13 = vsel %vm370_vm3, %v2052_v30, %v2054_v9 }
 0x259   : > { %v893_v1 = vmul.f32 %v882_v10, %v1617_v62  ;;  %v894_v53 = vmul.f32 %v886_v5, %v1619_v63  ;;  %1184 = vmatpush.bf16.msra.mxu2 %v1009_v22  ;;  %1241 = vmatpush.bf16.msrb.mxu1 %v1010_v12  ;;  %v1083_v62 = vunpack.c.l.b16 %v2104_v11  ;;  %v739_v21 = vpack.c.bf16 %v734_v46, %v733_v33 }
 0x25a   : > { %v2124_v3 = vpack.c.bf16 %v858_v8, %v857_v29  ;;  %v692_v17 = vsel %vm287_vm1, %v684_v54, %v676_v31  ;;  %v820_v9 = vmul.f32 %v813_v13, %v1598_v48  ;;  %v1063_v5 = vunpack.c.l.b16 %v2122_v19 }
 0x25b   : > { %v2112_v50 = vpack.c.bf16 %v894_v53, %v893_v1  ;;  %v699_v27 = vmul.f32 %v692_v17, %v1575_v37  ;;  %v983_v10 = vunpack.c.l.b16 %v739_v21  ;;  %v698_v53 = vmul.f32 %v687_v16, %v1577_v38 }
 0x25c   : > { %v783_v33 = vmul.f32 %v1796_v52, %v1543_v7  ;;  %v779_v17 = vmul.f32 %v1732_v25, %v1543_v7 }
 0x25d   : > { %1185 = vmatpush.bf16.msra.mxu2 %v1946_v55  ;;  %v1085_v63 = vunpack.c.l.b16 %v2112_v50  ;;  %1242 = vmatpush.bf16.msrb.mxu1 %v1948_v57  ;;  %v688_v55 = vsel %vm287_vm1, %v676_v31, %v684_v54  ;;  %v819_v31 = vmul.f32 %v809_v2, %v1596_v47  ;;  %v984_v54 = vunpack.c.h.b16 %v739_v21 }
 0x25e   : > { %v700_v30 = vmul.f32 %v688_v55, %v1577_v38 }
 0x25f   : > { %v720_v4 = vpop.permute.xlu1 %719  ;;  %v806_v59 = vpop.permute.xlu0 %805  ;;  %v1089_v14 = vpack.c.b16 %v1085_v63, %v1083_v62  ;;  %v2163_v63 = vpack.c.bf16 %v820_v9, %v819_v31 }
 0x260   : > { %v724_v60 = vsel %vm309_vm6, %v712_v49, %v720_v4  ;;  %v728_v57 = vsel %vm309_vm6, %v720_v4, %v712_v49  ;;  %v2134_v34 = vpop.permute.xlu2 %903  ;;  %v691_v49 = vsel %vm287_vm1, %v2060_v56, %v2042_v41  ;;  %v704_v46 = vpack.c.bf16 %v700_v30, %v699_v27 }
 0x261   : > { %v735_v22 = vmul.f32 %v728_v57, %v1664_v39  ;;  %v736_v12 = vmul.f32 %v724_v60, %v1666_v40  ;;  %1203 = vmatpush.bf16.msra.mxu3 %v1089_v14  ;;  %v1065_v40 = vunpack.c.l.b16 %v2124_v3  ;;  %v697_v1 = vmul.f32 %v691_v49, %v1575_v37 }
 0x262   : > { %v651_v4 = vsel %vm266_vm2, %v2058_v35, %v2056_v28  ;;  %v965_v55 = vunpack.c.l.b16 %v704_v46  ;;  %v1043_v60 = vunpack.c.l.b16 %v2163_v63  ;;  %v966_v57 = vunpack.c.h.b16 %v704_v46 }
 0x263   : > { %v740_v39 = vpack.c.bf16 %v736_v12, %v735_v22  ;;  %v1069_v8 = vpack.c.b16 %v1065_v40, %v1063_v5  ;;  %v703_v2 = vpack.c.bf16 %v698_v53, %v697_v1  ;;  %v662_v13 = vmul.f32 %v651_v4, %v1590_v44  ;;  %v2356_v4 = vld [vmem:[#allocation3_spill] sm:$0xff] }
 0x265   : > { %1204 = vmatpush.bf16.msra.mxu3 %v1968_v23  ;;  %v985_v41 = vunpack.c.l.b16 %v740_v39  ;;  %v986_v56 = vunpack.c.h.b16 %v740_v39  ;;  %v784_v23 = vmul.f32 %v1794_v51, %v1541_v6  ;;  %v785_v51 = vmul.f32 %v1830_v0, %v1543_v7 }
 0x266   : > { %v964_v22 = vunpack.c.h.b16 %v703_v2 }
 0x267   : > { %v798_v15 = vpop.permute.xlu1 %797  ;;  %v2161_v61 = vpop.permute.xlu0 %899  ;;  %v989_v29 = vpack.c.b16 %v985_v41, %v983_v10  ;;  %v990_v62 = vpack.c.b16 %v986_v56, %v984_v54  ;;  %v2200_v12 = vpack.c.bf16 %v784_v23, %v783_v33  ;;  %v2354_v41 = vld [vmem:[#allocation7_spill] sm:$0xff] }
 0x268   : > { %v810_v37 = vsel %vm370_vm3, %v798_v15, %v806_v59  ;;  %v814_v38 = vsel %vm370_vm3, %v806_v59, %v798_v15  ;;  %v655_v59 = vsel %vm266_vm2, %v2056_v28, %v2058_v35  ;;  %v914_v14 = vpop.permute.xlu2 %913  ;;  %v780_v28 = vmul.f32 %v1734_v26, %v1541_v6 }
 0x269   : > { %v821_v52 = vmul.f32 %v810_v37, %v1596_v47  ;;  %v822_v21 = vmul.f32 %v814_v38, %v1598_v48  ;;  %1186 = vmatpush.bf16.msra.mxu2 %v989_v29  ;;  %1205 = vmatpush.bf16.msra.mxu3 %v1069_v8  ;;  %v786_v47 = vmul.f32 %v1822_v58, %v1541_v6  ;;  %v963_v58 = vunpack.c.l.b16 %v703_v2 }
 0x26a   : > { %1243 = vmatpush.bf16.msrb.mxu1 %v990_v62  ;;  %v781_v35 = vmul.f32 %v1768_v42, %v1543_v7  ;;  %v661_v0 = vmul.f32 %v655_v59, %v1588_v43  ;;  %v782_v7 = vmul.f32 %v1760_v36, %v1541_v6  ;;  %v970_v27 = vpack.c.b16 %v966_v57, %v964_v22 }
 0x26b   : > { %v2185_v48 = vpack.c.bf16 %v822_v21, %v821_v52  ;;  %v2202_v26 = vpack.c.bf16 %v786_v47, %v785_v51  ;;  %v969_v16 = vpack.c.b16 %v965_v55, %v963_v58  ;;  %v1023_v6 = vunpack.c.l.b16 %v2200_v12  ;;  %v2355_v21 = vld [vmem:[#allocation2_spill] sm:$0xff]  ;;  %v1400_v55 = vld [vmem:[%s2333_s3] sm:$0xf]  ;;  %v1432_v58 = vld [vmem:[%s2333_s3 + $0x4] sm:$0xf] }
 0x26c   : > { %v2214_v40 = vpack.c.bf16 %v780_v28, %v779_v17  ;;  %v2216_v9 = vpack.c.bf16 %v782_v7, %v781_v35  ;;  %v1086_v15 = vunpack.c.h.b16 %v2112_v50 }
 0x26d   : > { %1187 = vmatpush.bf16.msra.mxu2 %v1996_v18  ;;  %1206 = vmatpush.bf16.msra.mxu3 %v1998_v20  ;;  %v1045_v25 = vunpack.c.l.b16 %v2185_v48  ;;  %v1025_v36 = vunpack.c.l.b16 %v2202_v26 }
 0x26e   : > { %1244 = vmatpush.bf16.msrb.mxu1 %v2020_v45  ;;  %v667_v45 = vpack.c.bf16 %v662_v13, %v661_v0  ;;  %v1019_v33 = vunpack.c.l.b16 %v2214_v40  ;;  %v1021_v46 = vunpack.c.l.b16 %v2216_v9 }
 0x26f   : > { %v640_v42 = vpop.permute.xlu1 %639  ;;  %v648_v31 = vpop.permute.xlu0 %647  ;;  %v1049_v49 = vpack.c.b16 %v1045_v25, %v1043_v60  ;;  %v1029_v56 = vpack.c.b16 %v1025_v36, %v1023_v6  ;;  %v1402_v25 = vld [vmem:[%s2333_s3 + $0xc] sm:$0xf0]  ;;  %v1066_v6 = vunpack.c.h.b16 %v2124_v3 }
 0x270   : > { %v652_v18 = vsel %vm266_vm2, %v640_v42, %v648_v31  ;;  %v656_v20 = vsel %vm266_vm2, %v648_v31, %v640_v42  ;;  %v908_v5 = vpop.permute.xlu2 %907  ;;  %v943_v54 = vunpack.c.l.b16 %v667_v45  ;;  %v1027_v57 = vpack.c.b16 %v1021_v46, %v1019_v33  ;;  %v1434_v33 = vld [vmem:[%s2333_s3 + $0x10] sm:$0xf0] }
 0x271   : > { %v663_v30 = vmul.f32 %v656_v20, %v1588_v43  ;;  %v664_v39 = vmul.f32 %v652_v18, %v1590_v44  ;;  %1188 = vmatpush.bf16.msra.mxu2 %v969_v16  ;;  %1207 = vmatpush.bf16.msra.mxu3 %v1049_v49  ;;  %v944_v43 = vunpack.c.h.b16 %v667_v45  ;;  %v2353_v44 = vld [vmem:[#allocation6_spill] sm:$0xff]  ;;  %v915_v29 = vsel %vm436_vm7, %v2161_v61, %v908_v5 }
 0x272   : > { %1245 = vmatpush.bf16.msrb.mxu1 %v970_v27  ;;  %v923_v28 = vmul.f32 %v915_v29, %v2355_v21  ;;  %v2358_v16 = vld [vmem:[#allocation10_spill] sm:$0xff]  ;;  %v2261_v45 = vor.u32 %v1432_v58, %v1402_v25  ;;  %v1046_v29 = vunpack.c.h.b16 %v2185_v48  ;;  %v1435_v48 = vld [vmem:[%s2333_s3 + $0x1c] sm:$0xf] }
 0x273   : > { %v668_v10 = vpack.c.bf16 %v664_v39, %v663_v30 }
 0x275   : > { %1189 = vmatpush.bf16.msra.mxu2 %v2028_v24  ;;  %v945_v1 = vunpack.c.l.b16 %v668_v10  ;;  %v946_v53 = vunpack.c.h.b16 %v668_v10  ;;  %1208 = vmatpush.bf16.msra.mxu3 %v2353_v44  ;;  %v919_v24 = vsel %vm436_vm7, %v908_v5, %v2161_v61 }
 0x276   : > { %1246 = vmatpush.bf16.msrb.mxu1 %v2354_v41  ;;  %v924_v35 = vmul.f32 %v919_v24, %v2356_v4  ;;  %v1412_v24 = vld [vmem:[%s2333_s3 + $0x18] sm:$0xf] }
 0x277   : > { %v912_v8 = vpop.permute.xlu1 %911  ;;  %v906_v62 = vpop.permute.xlu0 %905  ;;  %v949_v37 = vpack.c.b16 %v945_v1, %v943_v54  ;;  %v950_v38 = vpack.c.b16 %v946_v53, %v944_v43  ;;  %v1064_v54 = vunpack.c.h.b16 %v2122_v19  ;;  %v2359_v43 = vld [vmem:[#allocation4_spill] sm:$0xff] }
 0x278   : > { %v917_v23 = vsel %vm436_vm7, %v2134_v34, %v912_v8  ;;  %v921_v50 = vsel %vm436_vm7, %v912_v8, %v2134_v34  ;;  %v918_v2 = vsel %vm436_vm7, %v906_v62, %v914_v14  ;;  %v922_v52 = vsel %vm436_vm7, %v914_v14, %v906_v62  ;;  %v1433_v34 = vld [vmem:[%s2333_s3 + $0x8] sm:$0xf0]  ;;  %v1436_v8 = vld [vmem:[%s2333_s3 + $0x20] sm:$0xf0] }
 0x279   : > { %v927_v61 = vmul.f32 %v917_v23, %v2355_v21  ;;  %v928_v59 = vmul.f32 %v921_v50, %v2356_v4  ;;  %v929_v51 = vmul.f32 %v918_v2, %v2355_v21  ;;  %v930_v47 = vmul.f32 %v922_v52, %v2356_v4  ;;  %1190 = vmatpush.bf16.msra.mxu2 %v949_v37  ;;  %v2360_v62 = vld [vmem:[#allocation5_spill] sm:$0xff]  ;;  %v1414_v23 = vld [vmem:[%s2333_s3 + $0x24] sm:$0xf0] }
 0x27a   : > { %1209 = vmatpush.bf16.msra.mxu3 %v1029_v56  ;;  %1247 = vmatpush.bf16.msrb.mxu1 %v950_v38  ;;  %v1084_v14 = vunpack.c.h.b16 %v2104_v11  ;;  %v1401_v13 = vor.u32 %v1433_v34, %v1400_v55  ;;  %v2357_v11 = vld [vmem:[#allocation9_spill] sm:$0xff]  ;;  %v931_v36 = vpack.c.bf16 %v924_v35, %v923_v28  ;;  %v1070_v32 = vpack.c.b16 %v1066_v6, %v1064_v54  ;;  %v1408_v56 = vld [vmem:[%s2333_s3 + $0x8] sm:$0xf]  ;;  %v1135_v28 = vpop.permute.xlu2 %1134 }
 0x27b   : > { %v933_v17 = vpack.c.bf16 %v928_v59, %v927_v61  ;;  %v934_v60 = vpack.c.bf16 %v930_v47, %v929_v51  ;;  %v1044_v37 = vunpack.c.h.b16 %v2163_v63  ;;  %v1413_v38 = vor.u32 %v1436_v8, %v1412_v24  ;;  %v1420_v59 = vld [vmem:[%s2333_s3 + $0x20] sm:$0xf]  ;;  %v1437_v51 = vld [vmem:[%s2333_s3 + $0x28] sm:$0xf0] }
 0x27c   : > { %v1090_v0 = vpack.c.b16 %v1086_v15, %v1084_v14  ;;  %v1099_v53 = vunpack.c.l.b16 %v931_v36  ;;  %v1100_v3 = vunpack.c.h.b16 %v931_v36  ;;  %v1409_v15 = vor.u32 %v1434_v33, %v1408_v56 }
 0x27d   : > { %v1104_v22 = vunpack.c.h.b16 %v933_v17  ;;  %v1106_v7 = vunpack.c.h.b16 %v934_v60  ;;  %1191 = vmatpush.bf16.msra.mxu2 %v2357_v11  ;;  %v1103_v42 = vunpack.c.l.b16 %v933_v17  ;;  %v1105_v31 = vunpack.c.l.b16 %v934_v60 }
 0x27e   : > { %1210 = vmatpush.bf16.msra.mxu3 %v1027_v57  ;;  %1248 = vmatpush.bf16.msrb.mxu1 %v2358_v16  ;;  %v1050_v50 = vpack.c.b16 %v1046_v29, %v1044_v37  ;;  %v1417_v2 = vor.u32 %v1435_v48, %v1414_v23  ;;  %v1024_v63 = vunpack.c.h.b16 %v2200_v12  ;;  %v1026_v52 = vunpack.c.h.b16 %v2202_v26 }
 0x27f   : > { %v902_v49 = vpop.permute.xlu1 %901  ;;  %v910_v18 = vpop.permute.xlu0 %909  ;;  %v1109_v20 = vpack.c.b16 %v1105_v31, %v1103_v42  ;;  %v1110_v27 = vpack.c.b16 %v1106_v7, %v1104_v22  ;;  %v1020_v12 = vunpack.c.h.b16 %v2214_v40  ;;  %v1421_v26 = vor.u32 %v1437_v51, %v1420_v59 }
 0x280   : > { %v916_v30 = vsel %vm436_vm7, %v902_v49, %v910_v18  ;;  %v920_v39 = vsel %vm436_vm7, %v910_v18, %v902_v49  ;;  %1192 = vmatmul.bf16.vlgmr.msra.gmra.mxu2 %v1401_v13  ;;  %v1030_v61 = vpack.c.b16 %v1026_v52, %v1024_v63 }
 0x281   : > { %1438 = vmatpush.bf16.msrb.mxu2 %v1090_v0  ;;  %v925_v10 = vmul.f32 %v916_v30, %v2355_v21  ;;  %v926_v5 = vmul.f32 %v920_v39, %v2356_v4  ;;  %1249 = vmatmul.bf16.vlgmr.msrb.gmra.mxu1 %v1401_v13  ;;  %v2361_v21 = vld [vmem:[#allocation8_spill] sm:$0xff]  ;;  %v1022_v4 = vunpack.c.h.b16 %v2216_v9 }
 0x282   : > { %1228 = vmatpush.bf16.msrb.mxu0 %v1109_v20  ;;  %1285 = vmatpush.bf16.msra.mxu1 %v1110_v27 }
 0x283   : > { %1446 = vmatpush.bf16.msrb.mxu3 %v1110_v27  ;;  %v932_v1 = vpack.c.bf16 %v926_v5, %v925_v10  ;;  %v1028_v47 = vpack.c.b16 %v1022_v4, %v1020_v12 }
 0x284   : > { %1211 = vmatmul.bf16.vlgmr.msra.gmra.mxu3 %v2261_v45 }
 0x285   : > { %1439 = vmatpush.bf16.msrb.mxu2 %v2359_v43  ;;  %v1101_v44 = vunpack.c.l.b16 %v932_v1  ;;  %v1102_v41 = vunpack.c.h.b16 %v932_v1 }
 0x287   : > { %v1107_v19 = vpack.c.b16 %v1101_v44, %v1099_v53  ;;  %v1108_v46 = vpack.c.b16 %v1102_v41, %v1100_v3  ;;  %v1130_v9 = vpop.permute.xlu1 %1129  ;;  %v1140_v42 = vpop.permute.xlu0 %1139 }
 0x289   : > { %1440 = vmatpush.bf16.msrb.mxu2 %v1070_v32  ;;  %1229 = vmatpush.bf16.msrb.mxu0 %v1107_v19 }
 0x28a   : > { %1286 = vmatpush.bf16.msra.mxu1 %v1108_v46  ;;  %1447 = vmatpush.bf16.msrb.mxu3 %v1108_v46 }
 0x28c   : > { %1422 = vmatmul.msk.bf16.vlgmr.msrb.gmra.mxu0 %vm1177_vm12, %v1409_v15 }
 0x28d   : > { %1260 = vmatpush.bf16.msra.mxu0 %v1090_v0  ;;  %1441 = vmatpush.bf16.msrb.mxu2 %v2360_v62 }
 0x28f   : > { %v1145_v39 = vpop.permute.xlu1 %1144 }
 0x290   : > { %1197 = vmatmul.bf16.gmra.mxu2 %v1413_v38 }
 0x291   : > { %1261 = vmatpush.bf16.msra.mxu0 %v2359_v43  ;;  %1442 = vmatpush.bf16.msrb.mxu2 %v1050_v50 }
 0x292   : > { %1254 = vmatmul.bf16.gmra.mxu1 %v1413_v38 }
 0x294   : > { %1216 = vmatmul.bf16.gmra.mxu3 %v1417_v2 }
 0x295   : > { %1262 = vmatpush.bf16.msra.mxu0 %v1070_v32  ;;  %1443 = vmatpush.bf16.msrb.mxu2 %v2361_v21 }
 0x299   : > { %1263 = vmatpush.bf16.msra.mxu0 %v2360_v62  ;;  %1444 = vmatpush.bf16.msrb.mxu2 %v1030_v61 }
 0x29c   : > { %1423 = vmatmul.msk.bf16.gmra.mxu0 %vm1177_vm12, %v1421_v26 }
 0x29d   : > { %1264 = vmatpush.bf16.msra.mxu0 %v1050_v50  ;;  %1445 = vmatpush.bf16.msrb.mxu2 %v1028_v47 }
 0x2a0   : > { %1273 = vmatmul.bf16.vlgmr.msrb.gmra.mxu2 %v1417_v2 }
 0x2a1   : > { %1265 = vmatpush.bf16.msra.mxu0 %v2361_v21 }
 0x2a2   : > { %1424 = vmatmul.msk.bf16.vlgmr.msra.gmra.mxu1 %vm1177_vm12, %v1409_v15 }
 0x2a4   : > { %1425 = vmatmul.msk.bf16.vlgmr.msrb.gmra.mxu3 %vm1177_vm12, %v1421_v26 }
 0x2a5   : > { %1266 = vmatpush.bf16.msra.mxu0 %v1030_v61 }
 0x2a9   : > { %1267 = vmatpush.bf16.msra.mxu0 %v1028_v47 }
 0x2ac   : > { %1268 = vmatmul.bf16.vlgmr.msra.gmra.mxu0 %v2261_v45 }
 0x2fe   : > { %v1250_v40 = vpop.f32.mrf.mxu1 }
 0x2ff   : > { %v1251_v19 = vadd.f32 %v1250_v40, %v1130_v9 }
 0x303   : > { %v1193_v55 = vpop.f32.mrf.mxu2 }
 0x304   : > { %v1194_v34 = vadd.f32 %v1193_v55, %v1130_v9 }
 0x306   : > { %v1252_v58 = vpop.f32.mrf.mxu1 }
 0x307   : > { %v1212_v14 = vpop.f32.mrf.mxu3  ;;  %v1253_v2 = vadd.f32 %v1252_v58, %v1135_v28 }
 0x308   : > { %v1213_v17 = vadd.f32 %v1212_v14, %v1194_v34 }
 0x309   : > { %v1231_v60 = vpop.f32.mrf.mxu0 }
 0x30a   : > { %v1232_v57 = vadd.f32 %v1231_v60, %v1213_v17 }
 0x30b   : > { %v1195_v35 = vpop.f32.mrf.mxu2 }
 0x30c   : > { %v1298_v0 = vmax.f32 %v1232_v57, 0.0  ;;  %v1196_v13 = vadd.f32 %v1195_v35, %v1135_v28 }
 0x30e   : > { %1306 = vst [vmem:[%s2317_s18] sm:$0xff] %v1298_v0 }
 0x30f   : > { %v1214_v25 = vpop.f32.mrf.mxu3  ;;  %v1255_v20 = vpop.f32.mrf.mxu1 }
 0x310   : > { %v1215_v22 = vadd.f32 %v1214_v25, %v1196_v13  ;;  %v1256_v32 = vadd.f32 %v1255_v20, %v1140_v42 }
 0x311   : > { %v1233_v7 = vpop.f32.mrf.mxu0 }
 0x312   : > { %v1234_v11 = vadd.f32 %v1233_v7, %v1215_v22 }
 0x313   : > { %v1198_v31 = vpop.f32.mrf.mxu2 }
 0x314   : > { %v1300_v16 = vmax.f32 %v1234_v11, 0.0  ;;  %v1199_v49 = vadd.f32 %v1198_v31, %v1140_v42 }
 0x316   : > { %1308 = vst [vmem:[%s2317_s18 + $0x10] sm:$0xff] %v1300_v16 }
 0x317   : > { %v1217_v18 = vpop.f32.mrf.mxu3  ;;  %v1257_v1 = vpop.f32.mrf.mxu1 }
 0x318   : > { %v1218_v27 = vadd.f32 %v1217_v18, %v1199_v49  ;;  %v1258_v24 = vadd.f32 %v1257_v1, %v1145_v39 }
 0x319   : > { %v1236_v45 = vpop.f32.mrf.mxu0 }
 0x31a   : > { %v1237_v30 = vadd.f32 %v1236_v45, %v1218_v27 }
 0x31b   : > { %v1200_v6 = vpop.f32.mrf.mxu2 }
 0x31c   : > { %v1302_v36 = vmax.f32 %v1237_v30, 0.0  ;;  %v1201_v10 = vadd.f32 %v1200_v6, %v1145_v39 }
 0x31e   : > { %1310 = vst [vmem:[%s2317_s18 + $0x20] sm:$0xff] %v1302_v36 }
 0x31f   : > { %v1219_v5 = vpop.f32.mrf.mxu3  ;;  %v1288_v29 = vpop.f32.mrf.mxu1 }
 0x320   : > { %v1220_v54 = vadd.f32 %v1219_v5, %v1201_v10 }
 0x321   : > { %v1238_v43 = vpop.f32.mrf.mxu0 }
 0x322   : > { %v1239_v53 = vadd.f32 %v1238_v43, %v1220_v54 }
 0x323   : > { %v1274_v44 = vpop.f32.mrf.mxu2 }
 0x324   : > { %v1304_v3 = vmax.f32 %v1239_v53, 0.0  ;;  %v1275_v41 = vadd.f32 %v1274_v44, %v1256_v32 }
 0x326   : > { %1312 = vst [vmem:[%s2317_s18 + $0x30] sm:$0xff] %v1304_v3 }
 0x327   : > { %v1293_v56 = vpop.f32.mrf.mxu3  ;;  %v1290_v61 = vpop.f32.mrf.mxu1 }
 0x328   : > { %v1294_v33 = vadd.f32 %v1293_v56, %v1275_v41 }
 0x329   : > { %v1269_v15 = vpop.f32.mrf.mxu0 }
 0x32a   : > { %v1303_v46 = vmax.f32 %v1294_v33, 0.0  ;;  %v1270_v8 = vadd.f32 %v1269_v15, %v1251_v19 }
 0x32b   : > { %v1276_v62 = vpop.f32.mrf.mxu2 }
 0x32c   : > { %1311 = vst [vmem:[%s2317_s18 + $0x28] sm:$0xff] %v1303_v46  ;;  %v1277_v37 = vadd.f32 %v1276_v62, %v1258_v24  ;;  %v1289_v38 = vadd.f32 %v1288_v29, %v1270_v8 }
 0x32e   : > { %v1299_v48 = vmax.f32 %v1289_v38, 0.0 }
 0x32f   : > { %v1295_v23 = vpop.f32.mrf.mxu3 }
 0x330   : > { %v1296_v50 = vadd.f32 %v1295_v23, %v1277_v37  ;;  %1307 = vst [vmem:[%s2317_s18 + $0x8] sm:$0xff] %v1299_v48 }
 0x331   : > { %v1271_v52 = vpop.f32.mrf.mxu0 }
 0x332   : > { %v1305_v63 = vmax.f32 %v1296_v50, 0.0  ;;  %v1272_v21 = vadd.f32 %v1271_v52, %v1253_v2 }
 0x334   : > { %1313 = vst [vmem:[%s2317_s18 + $0x38] sm:$0xff] %v1305_v63  ;;  %v1291_v4 = vadd.f32 %v1290_v61, %v1272_v21 }
 0x336   : > { %v1301_v59 = vmax.f32 %v1291_v4, 0.0 }
 0x338   : > { %1309 = vst [vmem:[%s2317_s18 + $0x18] sm:$0xff] %v1301_v59 }
 0x339 PF: > { %s16_s21 = sadd.s32 1, %s1474_s21  }
 0x33a   : > { %p13_p4 = scmp.ge.s32.totalorder %s16_s21, 4  }
 0x33c   :  { %15 = sbr.rel (!%p13_p4) target bundleno = 1 (0x1), region = 82 }

</bundles_post_ra>
